<compile_context>
chip_gen: v5e
topology: v5e:2x2
jax: 0.10.0
libtpu: 0.0.40
codegen_flags: <defaults>
</compile_context>

<pallas_src>
import math

import jax
import jax.numpy as jnp
from jax.experimental import pallas as pl
from jax.experimental.pallas import tpu as pltpu


def _mxu(a, b):
    """bf16-in / f32-accumulate MXU matmul (identical op in kernel and reference)."""
    return jnp.dot(a.astype(jnp.bfloat16), b.astype(jnp.bfloat16),
                   preferred_element_type=jnp.float32)


# ----------------------------------------------------------------------------
# ONE fused kernel: projection -> GIN hops -> GAT(+ReLU) -> hop attention ->
# pool/select -> fc.  Single VMEM block, everything resident.
# ----------------------------------------------------------------------------
def _make_fused_kernel(num_layers, num_attn_heads, negative_slope=0.2):
    n_hops = num_layers + 1

    def kernel(*refs):
        (x_ref, adj_ref, pool_ref, seg_ref, segt_ref,
         proj_w_ref, proj_b_ref) = refs[:7]
        i = 7
        gin_refs = []
        for _ in range(num_layers):
            gin_refs.append(refs[i:i + 4])
            i += 4
        gat_w_ref, asrc_ref, adst_ref, gat_bias_ref = refs[i:i + 4]
        i += 4
        (wq_ref, bq_ref, wk_ref, bk_ref,
         wv_ref, bv_ref, wo_ref, bo_ref) = refs[i:i + 8]
        i += 8
        fc_w_ref, fc_b_ref, out_ref = refs[i], refs[i + 1], refs[i + 2]

        f32 = jnp.float32
        adj = adj_ref[...]                                   # (N, N) bf16 (exact counts)
        n = adj.shape[0]

        # ---- input projection (features lane-padded to 128 at init/wrapper) ----
        x0 = _mxu(x_ref[...], proj_w_ref[...]) + proj_b_ref[...]          # (N, H)

        # ---- GIN hops: h = MLP(x + A @ x), MLP = ReLU o Lin o ReLU o Lin ----
        x_hops = [x0]
        for (w1_ref, b1_ref, w2_ref, b2_ref) in gin_refs:
            xp = x_hops[-1]
            hcur = _mxu(adj, xp) + xp
            hcur = jnp.maximum(_mxu(hcur, w1_ref[...]) + b1_ref[...], 0.0)
            hcur = jnp.maximum(_mxu(hcur, w2_ref[...]) + b2_ref[...], 0.0)
            x_hops.append(hcur)

        # ---- GAT (4-head dense masked attention) + ReLU ----
        x_cat = jnp.concatenate(x_hops, axis=-1)                           # (N, (L+1)H)
        z_all = _mxu(x_cat, gat_w_ref[...])                                # (N, H) one wide matmul
        gat_heads = asrc_ref.shape[0]
        o_per_head = z_all.shape[1] // gat_heads

        # attention logits for ALL heads in one matmul each (no M=1 matvecs)
        a_dst = jnp.dot(z_all, adst_ref[...], preferred_element_type=f32)  # (N, heads)
        a_src = jax.lax.dot_general(asrc_ref[...], z_all,
                                    (((1,), (1,)), ((), ())),
                                    preferred_element_type=f32)            # (heads, N)

        # additive mask built ONCE (incoming edges + self loops)
        row_ids = jax.lax.broadcasted_iota(jnp.int32, (n, n), 0)
        col_ids = jax.lax.broadcasted_iota(jnp.int32, (n, n), 1)
        connected = jnp.logical_or(adj > 0, row_ids == col_ids)
        mask_bias = jnp.where(connected, 0.0, -1e30).astype(f32)

        head_outs = []
        for hh in range(gat_heads):
            e = a_dst[:, hh:hh + 1] + a_src[hh:hh + 1, :]                  # (N, N)
            e = jnp.where(e > 0, e, negative_slope * e) + mask_bias
            m = jnp.max(e, axis=-1, keepdims=True)
            p = jnp.exp(e - m)
            attn = p * pl.reciprocal(jnp.sum(p, axis=-1, keepdims=True), approx=True)
            head_outs.append(_mxu(attn, z_all[:, hh * o_per_head:(hh + 1) * o_per_head]))
        xg = jnp.maximum(jnp.concatenate(head_outs, axis=-1) + gat_bias_ref[...], 0.0)

        # ---- MultiheadAttention over the hop axis (Q = GAT out, K = V = hops) ----
        seg = seg_ref[...]                      # (H, heads)   0/1 head-segment indicator
        seg_t = segt_ref[...]                   # (heads, H)
        attn_heads = seg.shape[1]
        head_dim = seg.shape[0] // attn_heads
        scale = 1.0 / math.sqrt(head_dim)

        q = _mxu(xg, wq_ref[...]) + bq_ref[...]                            # (N, H)
        kv_stack = jnp.concatenate(x_hops, axis=0)                         # ((L+1)N, H) tall
        k_all = _mxu(kv_stack, wk_ref[...]) + bk_ref[...]                  # one matmul, all hops
        v_all = _mxu(kv_stack, wv_ref[...]) + bv_ref[...]

        scores = []
        for l in range(n_hops):
            k_l = k_all[l * n:(l + 1) * n, :]
            # full-width q*k product, per-head reduction via segment-indicator matmul
            scores.append(jnp.dot(q * k_l, seg, preferred_element_type=f32) * scale)
        m = scores[0]
        for s in scores[1:]:
            m = jnp.maximum(m, s)
        exps = [jnp.exp(s - m) for s in scores]
        denom = exps[0]
        for e in exps[1:]:
            denom = denom + e
        inv = pl.reciprocal(denom, approx=True)
        attn_out = jnp.zeros_like(q)
        for l in range(n_hops):
            # broadcast the (N, heads) weights back to full width lane-densely
            w_full = jnp.dot(exps[l] * inv, seg_t, preferred_element_type=f32)
            attn_out = attn_out + w_full * v_all[l * n:(l + 1) * n, :]
        xh = _mxu(attn_out, wo_ref[...]) + bo_ref[...]                     # (N, H)

        # ---- global mean pool (or target-row select) + fc, lane-dense output ----
        pooled = jnp.dot(pool_ref[...], xh, preferred_element_type=f32)    # (R, H)
        out_ref[...] = (jnp.dot(pooled, fc_w_ref[...], preferred_element_type=f32)
                        + fc_b_ref[...]).astype(out_ref.dtype)

    return kernel


# ----------------------------------------------------------------------------
# Parameters (deterministic init; weights stored pre-transposed as (in, out);
# lane padding and block-diagonal GAT attention layouts built ONCE here).
# ----------------------------------------------------------------------------
def init_graphhop_params(key, num_node_features=3, hidden_dim=128, embedding_dim=64,
                         num_layers=1, num_attn_heads=8, gat_heads=4):
    h = hidden_dim
    keys = iter(jax.random.split(key, 32))

    def uni(k, shape, scale):
        return jax.random.uniform(k, shape, jnp.float32, -scale, scale)

    def linear_p(k, in_dim, out_dim):
        k1, k2 = jax.random.split(k)
        s = 1.0 / math.sqrt(in_dim)
        return uni(k1, (in_dim, out_dim), s), uni(k2, (1, out_dim), s)

    params = {}
    proj_w, proj_b = linear_p(next(keys), num_node_features, h)
    f_pad = ((num_node_features + 127) // 128) * 128
    params["proj_w_raw"] = proj_w
    params["proj_w"] = jnp.pad(proj_w, ((0, f_pad - num_node_features), (0, 0)))
    params["proj_b"] = proj_b

    params["gin"] = []
    for _ in range(num_layers):
        w1, b1 = linear_p(next(keys), h, h)
        w2, b2 = linear_p(next(keys), h, h)
        params["gin"].append({"w1": w1, "b1": b1, "w2": w2, "b2": b2})

    gat_in = h * (num_layers + 1)
    gat_out = h // 4
    s = 1.0 / math.sqrt(gat_in)
    att_src = uni(next(keys), (gat_heads, gat_out), s)
    att_dst = uni(next(keys), (gat_heads, gat_out), s)
    params["gat_w"] = uni(next(keys), (gat_in, gat_heads * gat_out), s)   # lin has no bias
    params["gat_att_src"] = att_src
    params["gat_att_dst"] = att_dst
    eye_h = jnp.eye(gat_heads, dtype=jnp.float32)
    # block-diagonal layouts so per-head GAT logits are ONE batched matmul each
    params["gat_att_src_rows"] = jnp.einsum("hc,hk->hkc", att_src, eye_h).reshape(
        gat_heads, gat_heads * gat_out)                                    # (heads, heads*out)
    params["gat_att_dst_cols"] = jnp.einsum("hc,hk->hkc", att_dst, eye_h).reshape(
        gat_heads, gat_heads * gat_out).T                                  # (heads*out, heads)
    params["gat_bias"] = jnp.zeros((1, gat_heads * gat_out), jnp.float32)

    for name in ("q", "k", "v", "o"):
        w, b = linear_p(next(keys), h, h)
        params["w" + name], params["b" + name] = w, b

    fc_w, fc_b = linear_p(next(keys), h, embedding_dim)
    e_pad = ((embedding_dim + 127) // 128) * 128
    params["fc_w"], params["fc_b"] = fc_w, fc_b
    params["fc_w_pad"] = jnp.pad(fc_w, ((0, 0), (0, e_pad - embedding_dim)))
    params["fc_b_pad"] = jnp.pad(fc_b, ((0, 0), (0, e_pad - embedding_dim)))
    return params


# ----------------------------------------------------------------------------
# Forward pass: thin JAX glue (graph bookkeeping) + ONE fused Pallas call.
# ----------------------------------------------------------------------------
def graphhop_forward(params, x, edge_index, batch, num_graphs, target_idx=None,
                     num_layers=1, num_attn_heads=8):
    n = x.shape[0]
    h = params["proj_b"].shape[1]
    n_hops = num_layers + 1

    # TODO(synk): the edge_index scatter -> dense adjacency (and the pooling one-hot)
    # stay in plain-JAX glue; the data-dependent scatter has no clean Pallas equivalent
    # at this scale.  bf16 is exact for 0/1/edge counts and halves the O(N^2) footprint.
    src, dst = edge_index[0], edge_index[1]
    adj = jnp.zeros((n, n), jnp.float32).at[dst, src].add(1.0).astype(jnp.bfloat16)

    f_in = x.shape[1]
    f_pad = params["proj_w"].shape[0]
    x_pad = jnp.pad(x, ((0, 0), (0, f_pad - f_in))) if f_pad != f_in else x

    if target_idx is not None:
        tgt = jnp.atleast_1d(jnp.asarray(target_idx, dtype=jnp.int32))
        pool = (tgt[:, None] == jnp.arange(n, dtype=jnp.int32)[None, :]).astype(jnp.float32)
    else:
        onehot = (batch[None, :] == jnp.arange(num_graphs, dtype=batch.dtype)[:, None]
                  ).astype(jnp.float32)
        pool = onehot / jnp.maximum(onehot.sum(axis=1, keepdims=True), 1.0)
    rows = pool.shape[0]

    head_dim = h // num_attn_heads
    seg = (jnp.arange(h)[:, None] // head_dim
           == jnp.arange(num_attn_heads)[None, :]).astype(jnp.float32)     # (H, heads)
    seg_t = seg.T                                                          # (heads, H)

    inputs = [x_pad, adj, pool, seg, seg_t, params["proj_w"], params["proj_b"]]
    for lp in params["gin"][:num_layers]:
        inputs += [lp["w1"], lp["b1"], lp["w2"], lp["b2"]]
    inputs += [params["gat_w"], params["gat_att_src_rows"], params["gat_att_dst_cols"],
               params["gat_bias"],
               params["wq"], params["bq"], params["wk"], params["bk"],
               params["wv"], params["bv"], params["wo"], params["bo"],
               params["fc_w_pad"], params["fc_b_pad"]]

    e_pad = params["fc_w_pad"].shape[1]
    gat_heads = params["gat_att_src_rows"].shape[0]

    in_bytes = sum(int(a.size) * a.dtype.itemsize for a in inputs)
    out_bytes = rows * e_pad * 4
    inter_bytes = 4 * (3 * n * n + (4 * n_hops + 10) * n * h)
    vmem_limit = int(min(max(2 * (in_bytes + out_bytes + inter_bytes), 32 << 20), 64 << 20))

    flops = (2 * n * h * (f_pad + num_layers * (n + 2 * h) + n_hops * h + 4 * h)
             + 2 * gat_heads * n * n * (h // gat_heads + 2)
             + 2 * rows * h * (n + e_pad))
    trans = gat_heads * n * n + n_hops * n * num_attn_heads
    cost = pl.CostEstimate(flops=int(flops), transcendentals=int(trans),
                           bytes_accessed=int(in_bytes + out_bytes))

    kernel = _make_fused_kernel(num_layers, num_attn_heads)
    # TODO(synk): for large N (esp. v7x: 64 MiB VMEM, 2 TensorCores) add a dst-row-tiled
    # grid with dimension_semantics=("parallel",) so adj/mask become (tile_N, N) strips
    # and the GAT softmax shards across cores; at this demo size one fused block wins.
    out_pad = pl.pallas_call(
        kernel,
        out_shape=jax.ShapeDtypeStruct((rows, e_pad), jnp.float32),
        in_specs=[pl.BlockSpec(memory_space=pltpu.MemorySpace.VMEM) for _ in inputs],
        out_specs=pl.BlockSpec(memory_space=pltpu.MemorySpace.VMEM),
        compiler_params=pltpu.CompilerParams(vmem_limit_bytes=vmem_limit),
        cost_estimate=cost,
    )(*inputs)
    return out_pad[:, :params["fc_b"].shape[1]]


# ----------------------------------------------------------------------------
# Pure-JAX reference (independent formulation; mirrors the kernel's bf16 MXU
# operand casts so the comparison tolerance can stay tight).
# ----------------------------------------------------------------------------
def graphhop_reference(params, x, edge_index, batch, num_graphs, target_idx=None,
                       num_layers=1, num_attn_heads=8):
    f32, bf16 = jnp.float32, jnp.bfloat16
    hi = jax.lax.Precision.HIGHEST
    n = x.shape[0]
    src, dst = edge_index[0], edge_index[1]
    adj = jnp.zeros((n, n), f32).at[dst, src].add(1.0)
    gat_mask = jnp.minimum(adj + jnp.eye(n, dtype=f32), 1.0)
    adj_bf = adj.astype(bf16)

    x0 = _mxu(x, params["proj_w_raw"]) + params["proj_b"]
    x_hops = [x0]
    for i in range(num_layers):
        lp = params["gin"][i]
        hcur = _mxu(adj_bf, x_hops[-1]) + x_hops[-1]
        hcur = jax.nn.relu(_mxu(hcur, lp["w1"]) + lp["b1"])
        hcur = jax.nn.relu(_mxu(hcur, lp["w2"]) + lp["b2"])
        x_hops.append(hcur)

    xc = jnp.concatenate(x_hops, axis=1)
    heads, oph = params["gat_att_src"].shape
    z = _mxu(xc, params["gat_w"]).reshape(n, heads, oph)
    a_s = (z * params["gat_att_src"][None]).sum(-1)
    a_d = (z * params["gat_att_dst"][None]).sum(-1)
    e = a_d[:, None, :] + a_s[None, :, :]
    e = jnp.where(e > 0, e, 0.2 * e)
    e = jnp.where(gat_mask[:, :, None] > 0, e, -1e30)
    attn = jax.nn.softmax(e, axis=1)
    xg = jax.nn.relu(
        jnp.einsum("ijh,jhc->ihc", attn.astype(bf16), z.astype(bf16),
                   preferred_element_type=f32).reshape(n, heads * oph)
        + params["gat_bias"])

    hd = xg.shape[1] // num_attn_heads
    q = (_mxu(xg, params["wq"]) + params["bq"]).reshape(n, num_attn_heads, hd)
    kv = jnp.stack(x_hops, axis=1)
    k = (_mxu(kv, params["wk"]) + params["bk"]).reshape(n, len(x_hops), num_attn_heads, hd)
    v = (_mxu(kv, params["wv"]) + params["bv"]).reshape(n, len(x_hops), num_attn_heads, hd)
    s = jnp.einsum("nhd,nlhd->nhl", q, k, precision=hi) / math.sqrt(hd)
    w = jax.nn.softmax(s, axis=-1)
    ao = jnp.einsum("nhl,nlhd->nhd", w, v, precision=hi).reshape(n, -1)
    xh = _mxu(ao, params["wo"]) + params["bo"]

    if target_idx is not None:
        sel = xh[jnp.atleast_1d(jnp.asarray(target_idx))]
        return jnp.dot(sel, params["fc_w"], precision=hi) + params["fc_b"]
    onehot = (batch[None, :] == jnp.arange(num_graphs, dtype=batch.dtype)[:, None]).astype(f32)
    pool = onehot / jnp.maximum(onehot.sum(axis=1, keepdims=True), 1.0)
    pooled = jnp.dot(pool, xh, precision=hi)
    return jnp.dot(pooled, params["fc_w"], precision=hi) + params["fc_b"]


if __name__ == "__main__":
    NUM_NODE_FEATURES = 3
    HIDDEN_DIM = 128          # lane-aligned small demo size (divisible by 8 heads and by 4)
    EMBEDDING_DIM = 64
    NUM_LAYERS = 1
    NUM_ATTN_HEADS = 8
    N_PER_GRAPH = 8
    NUM_GRAPHS = 2
    N = N_PER_GRAPH * NUM_GRAPHS

    root = jax.random.PRNGKey(0)
    k_x, k_p = jax.random.split(root)
    x = jax.random.normal(k_x, (N, NUM_NODE_FEATURES), dtype=jnp.float32)

    edges = []
    for g in range(NUM_GRAPHS):                    # directed ring per graph, both directions
        base = g * N_PER_GRAPH
        for i in range(N_PER_GRAPH):
            a, b = base + i, base + (i + 1) % N_PER_GRAPH
            edges.append((a, b))
            edges.append((b, a))
    edge_index = jnp.array(edges, dtype=jnp.int32).T          # (2, E), [src; dst]
    batch = jnp.repeat(jnp.arange(NUM_GRAPHS, dtype=jnp.int32), N_PER_GRAPH)

    params = init_graphhop_params(k_p, NUM_NODE_FEATURES, HIDDEN_DIM, EMBEDDING_DIM,
                                  NUM_LAYERS, NUM_ATTN_HEADS)

    @jax.jit
    def run(p, xx, ei, bb):
        return graphhop_forward(p, xx, ei, bb, NUM_GRAPHS,
                                num_layers=NUM_LAYERS, num_attn_heads=NUM_ATTN_HEADS)

    out = jax.block_until_ready(run(params, x, edge_index, batch))
    assert out.shape == (NUM_GRAPHS, EMBEDDING_DIM)

    ref = jax.block_until_ready(
        graphhop_reference(params, x, edge_index, batch, NUM_GRAPHS,
                           num_layers=NUM_LAYERS, num_attn_heads=NUM_ATTN_HEADS))
    # bf16 MXU operand casts are mirrored in the reference; the only un-mirrored
    # differences are the EUP approx reciprocals and reduction order, so 5e-3 is ample.
    assert bool(jnp.allclose(out, ref, rtol=5e-3, atol=5e-3)), "mismatch vs pure-JAX reference"

    print("KERNEL_OK")
</pallas_src>

<mosaic_0001>
module attributes {stable_mosaic.version = 11 : i64} {
  func.func @kernel(%arg0: memref<16x128xf32, #tpu.memory_space<vmem>>, %arg1: memref<16x16xbf16, #tpu.memory_space<vmem>>, %arg2: memref<2x16xf32, #tpu.memory_space<vmem>>, %arg3: memref<128x8xf32, #tpu.memory_space<vmem>>, %arg4: memref<8x128xf32, #tpu.memory_space<vmem>>, %arg5: memref<128x128xf32, #tpu.memory_space<vmem>>, %arg6: memref<1x128xf32, #tpu.memory_space<vmem>>, %arg7: memref<128x128xf32, #tpu.memory_space<vmem>>, %arg8: memref<1x128xf32, #tpu.memory_space<vmem>>, %arg9: memref<128x128xf32, #tpu.memory_space<vmem>>, %arg10: memref<1x128xf32, #tpu.memory_space<vmem>>, %arg11: memref<256x128xf32, #tpu.memory_space<vmem>>, %arg12: memref<4x128xf32, #tpu.memory_space<vmem>>, %arg13: memref<128x4xf32, #tpu.memory_space<vmem>>, %arg14: memref<1x128xf32, #tpu.memory_space<vmem>>, %arg15: memref<128x128xf32, #tpu.memory_space<vmem>>, %arg16: memref<1x128xf32, #tpu.memory_space<vmem>>, %arg17: memref<128x128xf32, #tpu.memory_space<vmem>>, %arg18: memref<1x128xf32, #tpu.memory_space<vmem>>, %arg19: memref<128x128xf32, #tpu.memory_space<vmem>>, %arg20: memref<1x128xf32, #tpu.memory_space<vmem>>, %arg21: memref<128x128xf32, #tpu.memory_space<vmem>>, %arg22: memref<1x128xf32, #tpu.memory_space<vmem>>, %arg23: memref<128x128xf32, #tpu.memory_space<vmem>>, %arg24: memref<1x128xf32, #tpu.memory_space<vmem>>, %arg25: memref<2x128xf32, #tpu.memory_space<vmem>>) attributes {dimension_semantics = [], scalar_prefetch = 0 : i64, scratch_operands = 0 : i64, tpu.core_type = #tpu.core_type<tc>} {
    %c0 = arith.constant 0 : index
    %c0_0 = arith.constant 0 : index
    %0 = vector.load %arg1[%c0, %c0_0] : memref<16x16xbf16, #tpu.memory_space<vmem>>, vector<16x16xbf16>
    %c0_1 = arith.constant 0 : index
    %c0_2 = arith.constant 0 : index
    %1 = vector.load %arg0[%c0_1, %c0_2] : memref<16x128xf32, #tpu.memory_space<vmem>>, vector<16x128xf32>
    %c0_3 = arith.constant 0 : index
    %c0_4 = arith.constant 0 : index
    %2 = vector.load %arg5[%c0_3, %c0_4] : memref<128x128xf32, #tpu.memory_space<vmem>>, vector<128x128xf32>
    %3 = arith.truncf %1 : vector<16x128xf32> to vector<16x128xbf16>
    %4 = arith.truncf %2 : vector<128x128xf32> to vector<128x128xbf16>
    %cst = arith.constant dense<0.000000e+00> : vector<16x128xf32>
    %5 = tpu.matmul %3, %4, %cst {dimension_numbers = #tpu.dot_dimension_numbers<[1], [0], [0], [1], [0, 0, 1, 1], [], []>} : vector<16x128xbf16>, vector<128x128xbf16>, vector<16x128xf32> -> vector<16x128xf32>
    %c0_5 = arith.constant 0 : index
    %c0_6 = arith.constant 0 : index
    %6 = vector.load %arg6[%c0_5, %c0_6] : memref<1x128xf32, #tpu.memory_space<vmem>>, vector<1x128xf32>
    %7 = vector.broadcast %6 : vector<1x128xf32> to vector<16x128xf32>
    %8 = arith.addf %5, %7 : vector<16x128xf32>
    %9 = arith.truncf %8 : vector<16x128xf32> to vector<16x128xbf16>
    %cst_7 = arith.constant dense<0.000000e+00> : vector<16x128xf32>
    %10 = tpu.matmul %0, %9, %cst_7 {dimension_numbers = #tpu.dot_dimension_numbers<[1], [0], [0], [1], [0, 0, 1, 1], [], []>} : vector<16x16xbf16>, vector<16x128xbf16>, vector<16x128xf32> -> vector<16x128xf32>
    %11 = arith.addf %10, %8 : vector<16x128xf32>
    %c0_8 = arith.constant 0 : index
    %c0_9 = arith.constant 0 : index
    %12 = vector.load %arg7[%c0_8, %c0_9] : memref<128x128xf32, #tpu.memory_space<vmem>>, vector<128x128xf32>
    %13 = arith.truncf %11 : vector<16x128xf32> to vector<16x128xbf16>
    %14 = arith.truncf %12 : vector<128x128xf32> to vector<128x128xbf16>
    %cst_10 = arith.constant dense<0.000000e+00> : vector<16x128xf32>
    %15 = tpu.matmul %13, %14, %cst_10 {dimension_numbers = #tpu.dot_dimension_numbers<[1], [0], [0], [1], [0, 0, 1, 1], [], []>} : vector<16x128xbf16>, vector<128x128xbf16>, vector<16x128xf32> -> vector<16x128xf32>
    %c0_11 = arith.constant 0 : index
    %c0_12 = arith.constant 0 : index
    %16 = vector.load %arg8[%c0_11, %c0_12] : memref<1x128xf32, #tpu.memory_space<vmem>>, vector<1x128xf32>
    %17 = vector.broadcast %16 : vector<1x128xf32> to vector<16x128xf32>
    %18 = arith.addf %15, %17 : vector<16x128xf32>
    %cst_13 = arith.constant 0.000000e+00 : f32
    %19 = vector.broadcast %cst_13 : f32 to vector<16x128xf32>
    %20 = arith.maximumf %18, %19 : vector<16x128xf32>
    %c0_14 = arith.constant 0 : index
    %c0_15 = arith.constant 0 : index
    %21 = vector.load %arg9[%c0_14, %c0_15] : memref<128x128xf32, #tpu.memory_space<vmem>>, vector<128x128xf32>
    %22 = arith.truncf %20 : vector<16x128xf32> to vector<16x128xbf16>
    %23 = arith.truncf %21 : vector<128x128xf32> to vector<128x128xbf16>
    %cst_16 = arith.constant dense<0.000000e+00> : vector<16x128xf32>
    %24 = tpu.matmul %22, %23, %cst_16 {dimension_numbers = #tpu.dot_dimension_numbers<[1], [0], [0], [1], [0, 0, 1, 1], [], []>} : vector<16x128xbf16>, vector<128x128xbf16>, vector<16x128xf32> -> vector<16x128xf32>
    %c0_17 = arith.constant 0 : index
    %c0_18 = arith.constant 0 : index
    %25 = vector.load %arg10[%c0_17, %c0_18] : memref<1x128xf32, #tpu.memory_space<vmem>>, vector<1x128xf32>
    %26 = vector.broadcast %25 : vector<1x128xf32> to vector<16x128xf32>
    %27 = arith.addf %24, %26 : vector<16x128xf32>
    %cst_19 = arith.constant 0.000000e+00 : f32
    %28 = vector.broadcast %cst_19 : f32 to vector<16x128xf32>
    %29 = arith.maximumf %27, %28 : vector<16x128xf32>
    %30 = tpu.concatenate %8, %29 in 1 : vector<16x128xf32>, vector<16x128xf32> -> vector<16x256xf32>
    %c0_20 = arith.constant 0 : index
    %c0_21 = arith.constant 0 : index
    %31 = vector.load %arg11[%c0_20, %c0_21] : memref<256x128xf32, #tpu.memory_space<vmem>>, vector<256x128xf32>
    %32 = arith.truncf %30 : vector<16x256xf32> to vector<16x256xbf16>
    %33 = arith.truncf %31 : vector<256x128xf32> to vector<256x128xbf16>
    %cst_22 = arith.constant dense<0.000000e+00> : vector<16x128xf32>
    %34 = tpu.matmul %32, %33, %cst_22 {dimension_numbers = #tpu.dot_dimension_numbers<[1], [0], [0], [1], [0, 0, 1, 1], [], []>} : vector<16x256xbf16>, vector<256x128xbf16>, vector<16x128xf32> -> vector<16x128xf32>
    %c0_23 = arith.constant 0 : index
    %c0_24 = arith.constant 0 : index
    %35 = vector.load %arg13[%c0_23, %c0_24] : memref<128x4xf32, #tpu.memory_space<vmem>>, vector<128x4xf32>
    %cst_25 = arith.constant dense<0.000000e+00> : vector<16x4xf32>
    %36 = tpu.matmul %34, %35, %cst_25 {dimension_numbers = #tpu.dot_dimension_numbers<[1], [0], [0], [1], [0, 0, 1, 1], [], []>} : vector<16x128xf32>, vector<128x4xf32>, vector<16x4xf32> -> vector<16x4xf32>
    %c0_26 = arith.constant 0 : index
    %c0_27 = arith.constant 0 : index
    %37 = vector.load %arg12[%c0_26, %c0_27] : memref<4x128xf32, #tpu.memory_space<vmem>>, vector<4x128xf32>
    %cst_28 = arith.constant dense<0.000000e+00> : vector<4x16xf32>
    %38 = tpu.matmul %37, %34, %cst_28 {dimension_numbers = #tpu.dot_dimension_numbers<[1], [1], [0], [0], [0, 0, 1, 0], [], []>} : vector<4x128xf32>, vector<16x128xf32>, vector<4x16xf32> -> vector<4x16xf32>
    %39 = tpu.iota {dimensions = array<i32: 0>} : vector<16x16xi32>
    %40 = tpu.iota {dimensions = array<i32: 1>} : vector<16x16xi32>
    %cst_29 = arith.constant 0.000000e+00 : bf16
    %41 = vector.broadcast %cst_29 : bf16 to vector<16x16xbf16>
    %42 = arith.cmpf ogt, %0, %41 : vector<16x16xbf16>
    %43 = arith.cmpi eq, %39, %40 : vector<16x16xi32>
    %44 = arith.ori %42, %43 : vector<16x16xi1>
    %cst_30 = arith.constant 0.000000e+00 : f32
    %cst_31 = arith.constant -1.000000e+30 : f32
    %45 = vector.broadcast %cst_30 : f32 to vector<16x16xf32>
    %46 = vector.broadcast %cst_31 : f32 to vector<16x16xf32>
    %47 = arith.select %44, %45, %46 : vector<16x16xi1>, vector<16x16xf32>
    %48 = vector.extract_strided_slice %36 {offsets = [0, 0], sizes = [16, 1], strides = [1, 1]} : vector<16x4xf32> to vector<16x1xf32>
    %49 = vector.extract_strided_slice %38 {offsets = [0, 0], sizes = [1, 16], strides = [1, 1]} : vector<4x16xf32> to vector<1x16xf32>
    %50 = vector.broadcast %48 : vector<16x1xf32> to vector<16x16xf32>
    %51 = vector.broadcast %49 : vector<1x16xf32> to vector<16x16xf32>
    %52 = arith.addf %50, %51 : vector<16x16xf32>
    %cst_32 = arith.constant 0.000000e+00 : f32
    %53 = vector.broadcast %cst_32 : f32 to vector<16x16xf32>
    %54 = arith.cmpf ogt, %52, %53 : vector<16x16xf32>
    %cst_33 = arith.constant 2.000000e-01 : f32
    %55 = vector.broadcast %cst_33 : f32 to vector<16x16xf32>
    %56 = arith.mulf %55, %52 : vector<16x16xf32>
    %57 = arith.select %54, %52, %56 : vector<16x16xi1>, vector<16x16xf32>
    %58 = arith.addf %57, %47 : vector<16x16xf32>
    %cst_34 = arith.constant dense<0xFF800000> : vector<16xf32>
    %59 = vector.multi_reduction <maximumf>, %58, %cst_34 [1] : vector<16x16xf32> to vector<16xf32>
    %60 = vector.shape_cast %59 : vector<16xf32> to vector<16x1xf32>
    %61 = vector.broadcast %60 : vector<16x1xf32> to vector<16x16xf32>
    %62 = arith.subf %58, %61 : vector<16x16xf32>
    %63 = math.exp %62 : vector<16x16xf32>
    %cst_35 = arith.constant dense<0.000000e+00> : vector<16xf32>
    %64 = vector.multi_reduction <add>, %63, %cst_35 [1] : vector<16x16xf32> to vector<16xf32>
    %65 = vector.shape_cast %64 : vector<16xf32> to vector<16x1xf32>
    %66 = tpu.reciprocal %65 {approx = true} : vector<16x1xf32> -> vector<16x1xf32>
    %67 = vector.broadcast %66 : vector<16x1xf32> to vector<16x16xf32>
    %68 = arith.mulf %63, %67 : vector<16x16xf32>
    %69 = vector.extract_strided_slice %34 {offsets = [0, 0], sizes = [16, 32], strides = [1, 1]} : vector<16x128xf32> to vector<16x32xf32>
    %70 = arith.truncf %68 : vector<16x16xf32> to vector<16x16xbf16>
    %71 = arith.truncf %69 : vector<16x32xf32> to vector<16x32xbf16>
    %cst_36 = arith.constant dense<0.000000e+00> : vector<16x32xf32>
    %72 = tpu.matmul %70, %71, %cst_36 {dimension_numbers = #tpu.dot_dimension_numbers<[1], [0], [0], [1], [0, 0, 1, 1], [], []>} : vector<16x16xbf16>, vector<16x32xbf16>, vector<16x32xf32> -> vector<16x32xf32>
    %73 = vector.extract_strided_slice %36 {offsets = [0, 1], sizes = [16, 1], strides = [1, 1]} : vector<16x4xf32> to vector<16x1xf32>
    %74 = vector.extract_strided_slice %38 {offsets = [1, 0], sizes = [1, 16], strides = [1, 1]} : vector<4x16xf32> to vector<1x16xf32>
    %75 = vector.broadcast %73 : vector<16x1xf32> to vector<16x16xf32>
    %76 = vector.broadcast %74 : vector<1x16xf32> to vector<16x16xf32>
    %77 = arith.addf %75, %76 : vector<16x16xf32>
    %cst_37 = arith.constant 0.000000e+00 : f32
    %78 = vector.broadcast %cst_37 : f32 to vector<16x16xf32>
    %79 = arith.cmpf ogt, %77, %78 : vector<16x16xf32>
    %cst_38 = arith.constant 2.000000e-01 : f32
    %80 = vector.broadcast %cst_38 : f32 to vector<16x16xf32>
    %81 = arith.mulf %80, %77 : vector<16x16xf32>
    %82 = arith.select %79, %77, %81 : vector<16x16xi1>, vector<16x16xf32>
    %83 = arith.addf %82, %47 : vector<16x16xf32>
    %cst_39 = arith.constant dense<0xFF800000> : vector<16xf32>
    %84 = vector.multi_reduction <maximumf>, %83, %cst_39 [1] : vector<16x16xf32> to vector<16xf32>
    %85 = vector.shape_cast %84 : vector<16xf32> to vector<16x1xf32>
    %86 = vector.broadcast %85 : vector<16x1xf32> to vector<16x16xf32>
    %87 = arith.subf %83, %86 : vector<16x16xf32>
    %88 = math.exp %87 : vector<16x16xf32>
    %cst_40 = arith.constant dense<0.000000e+00> : vector<16xf32>
    %89 = vector.multi_reduction <add>, %88, %cst_40 [1] : vector<16x16xf32> to vector<16xf32>
    %90 = vector.shape_cast %89 : vector<16xf32> to vector<16x1xf32>
    %91 = tpu.reciprocal %90 {approx = true} : vector<16x1xf32> -> vector<16x1xf32>
    %92 = vector.broadcast %91 : vector<16x1xf32> to vector<16x16xf32>
    %93 = arith.mulf %88, %92 : vector<16x16xf32>
    %94 = vector.extract_strided_slice %34 {offsets = [0, 32], sizes = [16, 32], strides = [1, 1]} : vector<16x128xf32> to vector<16x32xf32>
    %95 = arith.truncf %93 : vector<16x16xf32> to vector<16x16xbf16>
    %96 = arith.truncf %94 : vector<16x32xf32> to vector<16x32xbf16>
    %cst_41 = arith.constant dense<0.000000e+00> : vector<16x32xf32>
    %97 = tpu.matmul %95, %96, %cst_41 {dimension_numbers = #tpu.dot_dimension_numbers<[1], [0], [0], [1], [0, 0, 1, 1], [], []>} : vector<16x16xbf16>, vector<16x32xbf16>, vector<16x32xf32> -> vector<16x32xf32>
    %98 = vector.extract_strided_slice %36 {offsets = [0, 2], sizes = [16, 1], strides = [1, 1]} : vector<16x4xf32> to vector<16x1xf32>
    %99 = vector.extract_strided_slice %38 {offsets = [2, 0], sizes = [1, 16], strides = [1, 1]} : vector<4x16xf32> to vector<1x16xf32>
    %100 = vector.broadcast %98 : vector<16x1xf32> to vector<16x16xf32>
    %101 = vector.broadcast %99 : vector<1x16xf32> to vector<16x16xf32>
    %102 = arith.addf %100, %101 : vector<16x16xf32>
    %cst_42 = arith.constant 0.000000e+00 : f32
    %103 = vector.broadcast %cst_42 : f32 to vector<16x16xf32>
    %104 = arith.cmpf ogt, %102, %103 : vector<16x16xf32>
    %cst_43 = arith.constant 2.000000e-01 : f32
    %105 = vector.broadcast %cst_43 : f32 to vector<16x16xf32>
    %106 = arith.mulf %105, %102 : vector<16x16xf32>
    %107 = arith.select %104, %102, %106 : vector<16x16xi1>, vector<16x16xf32>
    %108 = arith.addf %107, %47 : vector<16x16xf32>
    %cst_44 = arith.constant dense<0xFF800000> : vector<16xf32>
    %109 = vector.multi_reduction <maximumf>, %108, %cst_44 [1] : vector<16x16xf32> to vector<16xf32>
    %110 = vector.shape_cast %109 : vector<16xf32> to vector<16x1xf32>
    %111 = vector.broadcast %110 : vector<16x1xf32> to vector<16x16xf32>
    %112 = arith.subf %108, %111 : vector<16x16xf32>
    %113 = math.exp %112 : vector<16x16xf32>
    %cst_45 = arith.constant dense<0.000000e+00> : vector<16xf32>
    %114 = vector.multi_reduction <add>, %113, %cst_45 [1] : vector<16x16xf32> to vector<16xf32>
    %115 = vector.shape_cast %114 : vector<16xf32> to vector<16x1xf32>
    %116 = tpu.reciprocal %115 {approx = true} : vector<16x1xf32> -> vector<16x1xf32>
    %117 = vector.broadcast %116 : vector<16x1xf32> to vector<16x16xf32>
    %118 = arith.mulf %113, %117 : vector<16x16xf32>
    %119 = vector.extract_strided_slice %34 {offsets = [0, 64], sizes = [16, 32], strides = [1, 1]} : vector<16x128xf32> to vector<16x32xf32>
    %120 = arith.truncf %118 : vector<16x16xf32> to vector<16x16xbf16>
    %121 = arith.truncf %119 : vector<16x32xf32> to vector<16x32xbf16>
    %cst_46 = arith.constant dense<0.000000e+00> : vector<16x32xf32>
    %122 = tpu.matmul %120, %121, %cst_46 {dimension_numbers = #tpu.dot_dimension_numbers<[1], [0], [0], [1], [0, 0, 1, 1], [], []>} : vector<16x16xbf16>, vector<16x32xbf16>, vector<16x32xf32> -> vector<16x32xf32>
    %123 = vector.extract_strided_slice %36 {offsets = [0, 3], sizes = [16, 1], strides = [1, 1]} : vector<16x4xf32> to vector<16x1xf32>
    %124 = vector.extract_strided_slice %38 {offsets = [3, 0], sizes = [1, 16], strides = [1, 1]} : vector<4x16xf32> to vector<1x16xf32>
    %125 = vector.broadcast %123 : vector<16x1xf32> to vector<16x16xf32>
    %126 = vector.broadcast %124 : vector<1x16xf32> to vector<16x16xf32>
    %127 = arith.addf %125, %126 : vector<16x16xf32>
    %cst_47 = arith.constant 0.000000e+00 : f32
    %128 = vector.broadcast %cst_47 : f32 to vector<16x16xf32>
    %129 = arith.cmpf ogt, %127, %128 : vector<16x16xf32>
    %cst_48 = arith.constant 2.000000e-01 : f32
    %130 = vector.broadcast %cst_48 : f32 to vector<16x16xf32>
    %131 = arith.mulf %130, %127 : vector<16x16xf32>
    %132 = arith.select %129, %127, %131 : vector<16x16xi1>, vector<16x16xf32>
    %133 = arith.addf %132, %47 : vector<16x16xf32>
    %cst_49 = arith.constant dense<0xFF800000> : vector<16xf32>
    %134 = vector.multi_reduction <maximumf>, %133, %cst_49 [1] : vector<16x16xf32> to vector<16xf32>
    %135 = vector.shape_cast %134 : vector<16xf32> to vector<16x1xf32>
    %136 = vector.broadcast %135 : vector<16x1xf32> to vector<16x16xf32>
    %137 = arith.subf %133, %136 : vector<16x16xf32>
    %138 = math.exp %137 : vector<16x16xf32>
    %cst_50 = arith.constant dense<0.000000e+00> : vector<16xf32>
    %139 = vector.multi_reduction <add>, %138, %cst_50 [1] : vector<16x16xf32> to vector<16xf32>
    %140 = vector.shape_cast %139 : vector<16xf32> to vector<16x1xf32>
    %141 = tpu.reciprocal %140 {approx = true} : vector<16x1xf32> -> vector<16x1xf32>
    %142 = vector.broadcast %141 : vector<16x1xf32> to vector<16x16xf32>
    %143 = arith.mulf %138, %142 : vector<16x16xf32>
    %144 = vector.extract_strided_slice %34 {offsets = [0, 96], sizes = [16, 32], strides = [1, 1]} : vector<16x128xf32> to vector<16x32xf32>
    %145 = arith.truncf %143 : vector<16x16xf32> to vector<16x16xbf16>
    %146 = arith.truncf %144 : vector<16x32xf32> to vector<16x32xbf16>
    %cst_51 = arith.constant dense<0.000000e+00> : vector<16x32xf32>
    %147 = tpu.matmul %145, %146, %cst_51 {dimension_numbers = #tpu.dot_dimension_numbers<[1], [0], [0], [1], [0, 0, 1, 1], [], []>} : vector<16x16xbf16>, vector<16x32xbf16>, vector<16x32xf32> -> vector<16x32xf32>
    %148 = tpu.concatenate %72, %97, %122, %147 in 1 : vector<16x32xf32>, vector<16x32xf32>, vector<16x32xf32>, vector<16x32xf32> -> vector<16x128xf32>
    %c0_52 = arith.constant 0 : index
    %c0_53 = arith.constant 0 : index
    %149 = vector.load %arg14[%c0_52, %c0_53] : memref<1x128xf32, #tpu.memory_space<vmem>>, vector<1x128xf32>
    %150 = vector.broadcast %149 : vector<1x128xf32> to vector<16x128xf32>
    %151 = arith.addf %148, %150 : vector<16x128xf32>
    %cst_54 = arith.constant 0.000000e+00 : f32
    %152 = vector.broadcast %cst_54 : f32 to vector<16x128xf32>
    %153 = arith.maximumf %151, %152 : vector<16x128xf32>
    %c0_55 = arith.constant 0 : index
    %c0_56 = arith.constant 0 : index
    %154 = vector.load %arg3[%c0_55, %c0_56] : memref<128x8xf32, #tpu.memory_space<vmem>>, vector<128x8xf32>
    %c0_57 = arith.constant 0 : index
    %c0_58 = arith.constant 0 : index
    %155 = vector.load %arg4[%c0_57, %c0_58] : memref<8x128xf32, #tpu.memory_space<vmem>>, vector<8x128xf32>
    %c0_59 = arith.constant 0 : index
    %c0_60 = arith.constant 0 : index
    %156 = vector.load %arg15[%c0_59, %c0_60] : memref<128x128xf32, #tpu.memory_space<vmem>>, vector<128x128xf32>
    %157 = arith.truncf %153 : vector<16x128xf32> to vector<16x128xbf16>
    %158 = arith.truncf %156 : vector<128x128xf32> to vector<128x128xbf16>
    %cst_61 = arith.constant dense<0.000000e+00> : vector<16x128xf32>
    %159 = tpu.matmul %157, %158, %cst_61 {dimension_numbers = #tpu.dot_dimension_numbers<[1], [0], [0], [1], [0, 0, 1, 1], [], []>} : vector<16x128xbf16>, vector<128x128xbf16>, vector<16x128xf32> -> vector<16x128xf32>
    %c0_62 = arith.constant 0 : index
    %c0_63 = arith.constant 0 : index
    %160 = vector.load %arg16[%c0_62, %c0_63] : memref<1x128xf32, #tpu.memory_space<vmem>>, vector<1x128xf32>
    %161 = vector.broadcast %160 : vector<1x128xf32> to vector<16x128xf32>
    %162 = arith.addf %159, %161 : vector<16x128xf32>
    %163 = tpu.concatenate %8, %29 in 0 : vector<16x128xf32>, vector<16x128xf32> -> vector<32x128xf32>
    %c0_64 = arith.constant 0 : index
    %c0_65 = arith.constant 0 : index
    %164 = vector.load %arg17[%c0_64, %c0_65] : memref<128x128xf32, #tpu.memory_space<vmem>>, vector<128x128xf32>
    %165 = arith.truncf %163 : vector<32x128xf32> to vector<32x128xbf16>
    %166 = arith.truncf %164 : vector<128x128xf32> to vector<128x128xbf16>
    %cst_66 = arith.constant dense<0.000000e+00> : vector<32x128xf32>
    %167 = tpu.matmul %165, %166, %cst_66 {dimension_numbers = #tpu.dot_dimension_numbers<[1], [0], [0], [1], [0, 0, 1, 1], [], []>} : vector<32x128xbf16>, vector<128x128xbf16>, vector<32x128xf32> -> vector<32x128xf32>
    %c0_67 = arith.constant 0 : index
    %c0_68 = arith.constant 0 : index
    %168 = vector.load %arg18[%c0_67, %c0_68] : memref<1x128xf32, #tpu.memory_space<vmem>>, vector<1x128xf32>
    %169 = vector.broadcast %168 : vector<1x128xf32> to vector<32x128xf32>
    %170 = arith.addf %167, %169 : vector<32x128xf32>
    %c0_69 = arith.constant 0 : index
    %c0_70 = arith.constant 0 : index
    %171 = vector.load %arg19[%c0_69, %c0_70] : memref<128x128xf32, #tpu.memory_space<vmem>>, vector<128x128xf32>
    %172 = arith.truncf %163 : vector<32x128xf32> to vector<32x128xbf16>
    %173 = arith.truncf %171 : vector<128x128xf32> to vector<128x128xbf16>
    %cst_71 = arith.constant dense<0.000000e+00> : vector<32x128xf32>
    %174 = tpu.matmul %172, %173, %cst_71 {dimension_numbers = #tpu.dot_dimension_numbers<[1], [0], [0], [1], [0, 0, 1, 1], [], []>} : vector<32x128xbf16>, vector<128x128xbf16>, vector<32x128xf32> -> vector<32x128xf32>
    %c0_72 = arith.constant 0 : index
    %c0_73 = arith.constant 0 : index
    %175 = vector.load %arg20[%c0_72, %c0_73] : memref<1x128xf32, #tpu.memory_space<vmem>>, vector<1x128xf32>
    %176 = vector.broadcast %175 : vector<1x128xf32> to vector<32x128xf32>
    %177 = arith.addf %174, %176 : vector<32x128xf32>
    %178 = vector.extract_strided_slice %170 {offsets = [0, 0], sizes = [16, 128], strides = [1, 1]} : vector<32x128xf32> to vector<16x128xf32>
    %179 = arith.mulf %162, %178 : vector<16x128xf32>
    %cst_74 = arith.constant dense<0.000000e+00> : vector<16x8xf32>
    %180 = tpu.matmul %179, %154, %cst_74 {dimension_numbers = #tpu.dot_dimension_numbers<[1], [0], [0], [1], [0, 0, 1, 1], [], []>} : vector<16x128xf32>, vector<128x8xf32>, vector<16x8xf32> -> vector<16x8xf32>
    %cst_75 = arith.constant 2.500000e-01 : f32
    %181 = vector.broadcast %cst_75 : f32 to vector<16x8xf32>
    %182 = arith.mulf %180, %181 : vector<16x8xf32>
    %183 = vector.extract_strided_slice %170 {offsets = [16, 0], sizes = [16, 128], strides = [1, 1]} : vector<32x128xf32> to vector<16x128xf32>
    %184 = arith.mulf %162, %183 : vector<16x128xf32>
    %cst_76 = arith.constant dense<0.000000e+00> : vector<16x8xf32>
    %185 = tpu.matmul %184, %154, %cst_76 {dimension_numbers = #tpu.dot_dimension_numbers<[1], [0], [0], [1], [0, 0, 1, 1], [], []>} : vector<16x128xf32>, vector<128x8xf32>, vector<16x8xf32> -> vector<16x8xf32>
    %cst_77 = arith.constant 2.500000e-01 : f32
    %186 = vector.broadcast %cst_77 : f32 to vector<16x8xf32>
    %187 = arith.mulf %185, %186 : vector<16x8xf32>
    %188 = arith.maximumf %182, %187 : vector<16x8xf32>
    %189 = arith.subf %182, %188 : vector<16x8xf32>
    %190 = math.exp %189 : vector<16x8xf32>
    %191 = arith.subf %187, %188 : vector<16x8xf32>
    %192 = math.exp %191 : vector<16x8xf32>
    %193 = arith.addf %190, %192 : vector<16x8xf32>
    %194 = tpu.reciprocal %193 {approx = true} : vector<16x8xf32> -> vector<16x8xf32>
    %cst_78 = arith.constant 0.000000e+00 : f32
    %195 = vector.broadcast %cst_78 : f32 to vector<16x128xf32>
    %196 = arith.mulf %190, %194 : vector<16x8xf32>
    %cst_79 = arith.constant dense<0.000000e+00> : vector<16x128xf32>
    %197 = tpu.matmul %196, %155, %cst_79 {dimension_numbers = #tpu.dot_dimension_numbers<[1], [0], [0], [1], [0, 0, 1, 1], [], []>} : vector<16x8xf32>, vector<8x128xf32>, vector<16x128xf32> -> vector<16x128xf32>
    %198 = vector.extract_strided_slice %177 {offsets = [0, 0], sizes = [16, 128], strides = [1, 1]} : vector<32x128xf32> to vector<16x128xf32>
    %199 = arith.mulf %197, %198 : vector<16x128xf32>
    %200 = arith.addf %195, %199 : vector<16x128xf32>
    %201 = arith.mulf %192, %194 : vector<16x8xf32>
    %cst_80 = arith.constant dense<0.000000e+00> : vector<16x128xf32>
    %202 = tpu.matmul %201, %155, %cst_80 {dimension_numbers = #tpu.dot_dimension_numbers<[1], [0], [0], [1], [0, 0, 1, 1], [], []>} : vector<16x8xf32>, vector<8x128xf32>, vector<16x128xf32> -> vector<16x128xf32>
    %203 = vector.extract_strided_slice %177 {offsets = [16, 0], sizes = [16, 128], strides = [1, 1]} : vector<32x128xf32> to vector<16x128xf32>
    %204 = arith.mulf %202, %203 : vector<16x128xf32>
    %205 = arith.addf %200, %204 : vector<16x128xf32>
    %c0_81 = arith.constant 0 : index
    %c0_82 = arith.constant 0 : index
    %206 = vector.load %arg21[%c0_81, %c0_82] : memref<128x128xf32, #tpu.memory_space<vmem>>, vector<128x128xf32>
    %207 = arith.truncf %205 : vector<16x128xf32> to vector<16x128xbf16>
    %208 = arith.truncf %206 : vector<128x128xf32> to vector<128x128xbf16>
    %cst_83 = arith.constant dense<0.000000e+00> : vector<16x128xf32>
    %209 = tpu.matmul %207, %208, %cst_83 {dimension_numbers = #tpu.dot_dimension_numbers<[1], [0], [0], [1], [0, 0, 1, 1], [], []>} : vector<16x128xbf16>, vector<128x128xbf16>, vector<16x128xf32> -> vector<16x128xf32>
    %c0_84 = arith.constant 0 : index
    %c0_85 = arith.constant 0 : index
    %210 = vector.load %arg22[%c0_84, %c0_85] : memref<1x128xf32, #tpu.memory_space<vmem>>, vector<1x128xf32>
    %211 = vector.broadcast %210 : vector<1x128xf32> to vector<16x128xf32>
    %212 = arith.addf %209, %211 : vector<16x128xf32>
    %c0_86 = arith.constant 0 : index
    %c0_87 = arith.constant 0 : index
    %213 = vector.load %arg2[%c0_86, %c0_87] : memref<2x16xf32, #tpu.memory_space<vmem>>, vector<2x16xf32>
    %cst_88 = arith.constant dense<0.000000e+00> : vector<2x128xf32>
    %214 = tpu.matmul %213, %212, %cst_88 {dimension_numbers = #tpu.dot_dimension_numbers<[1], [0], [0], [1], [0, 0, 1, 1], [], []>} : vector<2x16xf32>, vector<16x128xf32>, vector<2x128xf32> -> vector<2x128xf32>
    %c0_89 = arith.constant 0 : index
    %c0_90 = arith.constant 0 : index
    %215 = vector.load %arg23[%c0_89, %c0_90] : memref<128x128xf32, #tpu.memory_space<vmem>>, vector<128x128xf32>
    %cst_91 = arith.constant dense<0.000000e+00> : vector<2x128xf32>
    %216 = tpu.matmul %214, %215, %cst_91 {dimension_numbers = #tpu.dot_dimension_numbers<[1], [0], [0], [1], [0, 0, 1, 1], [], []>} : vector<2x128xf32>, vector<128x128xf32>, vector<2x128xf32> -> vector<2x128xf32>
    %c0_92 = arith.constant 0 : index
    %c0_93 = arith.constant 0 : index
    %217 = vector.load %arg24[%c0_92, %c0_93] : memref<1x128xf32, #tpu.memory_space<vmem>>, vector<1x128xf32>
    %218 = vector.broadcast %217 : vector<1x128xf32> to vector<2x128xf32>
    %219 = arith.addf %216, %218 : vector<2x128xf32>
    %c0_94 = arith.constant 0 : index
    %c0_95 = arith.constant 0 : index
    %220 = vector.load %arg25[%c0_94, %c0_95] : memref<2x128xf32, #tpu.memory_space<vmem>>, vector<2x128xf32>
    tpu.vector_store %arg25[%c0_94, %c0_95], %219 {strides = array<i32>} : memref<2x128xf32, #tpu.memory_space<vmem>>, vector<2x128xf32>,
    return
  }
}

</mosaic_0001>

<bundles_post_ra>
// kernel: run.1
= control target key start
LH: loop header
LB: loop body
LE: loop exit
PB: predicated region body
PF: predicated region fallthrough
CT: control target
= control target key end

     0   :  { %s2063_s0 = inlined_call_operand.vmem [shape: f32[16,128], index: 0, kind: input, shape index: {}]   ;;  %s2064_s1 = inlined_call_operand.vmem [shape: bf16[16,16], index: 1, kind: input, shape index: {}]   ;;  %s2065_s2 = inlined_call_operand.vmem [shape: f32[2,16], index: 2, kind: input, shape index: {}]   ;;  %s2066_s3 = inlined_call_operand.vmem [shape: f32[128,8], index: 3, kind: input, shape index: {}]   ;;  %s2067_s4 = inlined_call_operand.vmem [shape: f32[8,128], index: 4, kind: input, shape index: {}]   ;;  %s2068_s5 = inlined_call_operand.vmem [shape: f32[128,128], index: 5, kind: input, shape index: {}]   ;;  %s2069_s6 = inlined_call_operand.vmem [shape: f32[1,128], index: 6, kind: input, shape index: {}]   ;;  %s2070_s7 = inlined_call_operand.vmem [shape: f32[128,128], index: 7, kind: input, shape index: {}]   ;;  %s2071_s8 = inlined_call_operand.vmem [shape: f32[1,128], index: 8, kind: input, shape index: {}]   ;;  %s2072_s9 = inlined_call_operand.vmem [shape: f32[128,128], index: 9, kind: input, shape index: {}]   ;;  %s2073_s10 = inlined_call_operand.vmem [shape: f32[1,128], index: 10, kind: input, shape index: {}]   ;;  %s2074_s11 = inlined_call_operand.vmem [shape: f32[256,128], index: 11, kind: input, shape index: {}]   ;;  %s2075_s12 = inlined_call_operand.vmem [shape: f32[4,128], index: 12, kind: input, shape index: {}]   ;;  %s2076_s13 = inlined_call_operand.vmem [shape: f32[128,4], index: 13, kind: input, shape index: {}]   ;;  %s2077_s14 = inlined_call_operand.vmem [shape: f32[1,128], index: 14, kind: input, shape index: {}]   ;;  %s2078_s15 = inlined_call_operand.vmem [shape: f32[128,128], index: 15, kind: input, shape index: {}]   ;;  %s2079_s16 = inlined_call_operand.vmem [shape: f32[1,128], index: 16, kind: input, shape index: {}]   ;;  %s2080_s17 = inlined_call_operand.vmem [shape: f32[128,128], index: 17, kind: input, shape index: {}]   ;;  %s2081_s18 = inlined_call_operand.vmem [shape: f32[1,128], index: 18, kind: input, shape index: {}]   ;;  %s2082_s19 = inlined_call_operand.vmem [shape: f32[128,128], index: 19, kind: input, shape index: {}]   ;;  %s2083_s20 = inlined_call_operand.vmem [shape: f32[1,128], index: 20, kind: input, shape index: {}]   ;;  %s2084_s21 = inlined_call_operand.vmem [shape: f32[128,128], index: 21, kind: input, shape index: {}]   ;;  %s2085_s22 = inlined_call_operand.vmem [shape: f32[1,128], index: 22, kind: input, shape index: {}]   ;;  %s2086_s23 = inlined_call_operand.vmem [shape: f32[128,128], index: 23, kind: input, shape index: {}]   ;;  %s2087_s24 = inlined_call_operand.vmem [shape: f32[1,128], index: 24, kind: input, shape index: {}]   ;;  %s2088_s25 = inlined_call_operand.hbm [shape: f32[2,128], index: 25, kind: output, shape index: {}]  }
   0x1   :  { %2095 = sst [smem:[#allocation5_spill]] %s2063_s0 }
   0x2   :  { %2096 = sst [smem:[#allocation6_spill]] %s2064_s1 }
   0x3   :  { %2097 = sst [smem:[#allocation7_spill]] %s2065_s2 }
   0x4   :  { %2098 = sst [smem:[#allocation8_spill]] %s2066_s3 }
   0x5   :  { %2099 = sst [smem:[#allocation9_spill]] %s2067_s4 }
   0x6   :  { %2100 = sst [smem:[#allocation10_spill]] %s2068_s5 }
   0x7   :  { %2101 = sst [smem:[#allocation11_spill]] %s2069_s6 }
   0x8   :  { %2102 = sst [smem:[#allocation12_spill]] %s2070_s7 }
   0x9   :  { %2103 = sst [smem:[#allocation13_spill]] %s2071_s8 }
   0xa   :  { %2104 = sst [smem:[#allocation14_spill]] %s2072_s9 }
   0xb   :  { %s2105_s6 = sld [smem:[#allocation10_spill]] }
  0x11   :  { %v100_v0 = vld [vmem:[%s2105_s6 + $0x70] sm:$0xff]  ;;  %v101_v1 = vld [vmem:[%s2105_s6 + $0x78] sm:$0xff]  ;;  %v98_v2 = vld [vmem:[%s2105_s6 + $0x60] sm:$0xff] }
  0x12   :  { %v110_v3 = vpack.c.bf16 %v101_v1, %v100_v0  ;;  %v99_v4 = vld [vmem:[%s2105_s6 + $0x68] sm:$0xff]  ;;  %v96_v6 = vld [vmem:[%s2105_s6 + $0x50] sm:$0xff]  ;;  %v97_v7 = vld [vmem:[%s2105_s6 + $0x58] sm:$0xff] }
  0x13   :  { %v109_v5 = vpack.c.bf16 %v99_v4, %v98_v2  ;;  %v94_v8 = vld [vmem:[%s2105_s6 + $0x40] sm:$0xff]  ;;  %v95_v9 = vld [vmem:[%s2105_s6 + $0x48] sm:$0xff]  ;;  %v108_v10 = vpack.c.bf16 %v97_v7, %v96_v6 }
  0x14   :  { %115 = vmatpush.bf16.msra.mxu0 %v110_v3 }
  0x18   :  { %116 = vmatpush.bf16.msra.mxu0 %v109_v5 }
  0x19   :  { %30 = vsyncpa [#allocation3], 0  ;;  %v107_v11 = vpack.c.bf16 %v95_v9, %v94_v8  ;;  %v92_v12 = vld [vmem:[%s2105_s6 + $0x30] sm:$0xff]  ;;  %v93_v13 = vld [vmem:[%s2105_s6 + $0x38] sm:$0xff]  ;;  %s2106_s1 = sld [smem:[#allocation5_spill]]  ;;  %vm135_vm0 = vcmask 130048  }
  0x1a   :  { %v106_v14 = vpack.c.bf16 %v93_v13, %v92_v12  ;;  %v90_v15 = vld [vmem:[%s2105_s6 + $0x20] sm:$0xff]  ;;  %v91_v16 = vld [vmem:[%s2105_s6 + $0x28] sm:$0xff]  ;;  %v88_v18 = vld [vmem:[%s2105_s6 + $0x10] sm:$0xff]  ;;  %s2107_s9 = sld [smem:[#allocation11_spill]]  ;;  %s1221_s2 = smov 32   ;;  %vm668_vm15 = vcmask 261120  }
  0x1b   :  { %v105_v17 = vpack.c.bf16 %v91_v16, %v90_v15  ;;  %v89_v19 = vld [vmem:[%s2105_s6 + $0x18] sm:$0xff]  ;;  %v86_v21 = vld [vmem:[%s2105_s6] sm:$0xff]  ;;  %v87_v22 = vld [vmem:[%s2105_s6 + $0x8] sm:$0xff]  ;;  %s2108_s8 = sld [smem:[#allocation6_spill]]  ;;  %s1222_s30 = smov 64  }
  0x1c   :  { %117 = vmatpush.bf16.msra.mxu0 %v108_v10  ;;  %v104_v20 = vpack.c.bf16 %v89_v19, %v88_v18  ;;  %v103_v23 = vpack.c.bf16 %v87_v22, %v86_v21  ;;  %v257_v29 = vld [vmem:[%s2074_s11 + $0x70] sm:$0xff]  ;;  %v258_v30 = vld [vmem:[%s2074_s11 + $0x78] sm:$0xff]  ;;  %v255_v36 = vld [vmem:[%s2074_s11 + $0x60] sm:$0xff]  ;;  %s2109_s28 = sld [smem:[#allocation12_spill]] }
  0x1d   :  { %v283_v34 = vpack.c.bf16 %v258_v30, %v257_v29  ;;  %v256_v37 = vld [vmem:[%s2074_s11 + $0x68] sm:$0xff]  ;;  %v253_v45 = vld [vmem:[%s2074_s11 + $0x50] sm:$0xff]  ;;  %v254_v46 = vld [vmem:[%s2074_s11 + $0x58] sm:$0xff]  ;;  %s2110_s29 = sld [smem:[#allocation14_spill]] }
  0x1e   :  { %v282_v42 = vpack.c.bf16 %v256_v37, %v255_v36  ;;  %v281_v50 = vpack.c.bf16 %v254_v46, %v253_v45  ;;  %v251_v51 = vld [vmem:[%s2074_s11 + $0x40] sm:$0xff]  ;;  %v252_v52 = vld [vmem:[%s2074_s11 + $0x48] sm:$0xff]  ;;  %v249_v57 = vld [vmem:[%s2074_s11 + $0x30] sm:$0xff]  ;;  %s2111_s4 = sld [smem:[#allocation13_spill]] }
  0x1f   :  { %v84_v24 = vld [vmem:[%s2106_s1] sm:$0xff]  ;;  %v85_v25 = vld [vmem:[%s2106_s1 + $0x8] sm:$0xff]  ;;  %v280_v56 = vpack.c.bf16 %v252_v52, %v251_v51  ;;  %v250_v58 = vld [vmem:[%s2074_s11 + $0x38] sm:$0xff] }
  0x20   :  { %118 = vmatpush.bf16.msra.mxu0 %v107_v11  ;;  %v102_v26 = vpack.c.bf16 %v85_v25, %v84_v24  ;;  %v1136_v28 = vld [vmem:[%s2107_s9] ss:$0 sm:$0xff]  ;;  %v279_v62 = vpack.c.bf16 %v250_v58, %v249_v57  ;;  %v248_v0 = vld [vmem:[%s2074_s11 + $0x28] sm:$0xff]  ;;  %v245_v3 = vld [vmem:[%s2074_s11 + $0x10] sm:$0xff] }
  0x21   :  { %v1120_v38 = vld [vmem:[%s2108_s8] sm:$0xff]  ;;  %v246_v4 = vld [vmem:[%s2074_s11 + $0x18] sm:$0xff]  ;;  %v244_v7 = vld [vmem:[%s2074_s11 + $0x8] sm:$0xff] }
  0x22   :  { %v167_v39 = vld [vmem:[%s2109_s28 + $0x70] sm:$0xff]  ;;  %v168_v40 = vld [vmem:[%s2109_s28 + $0x78] sm:$0xff]  ;;  %v165_v41 = vld [vmem:[%s2109_s28 + $0x60] sm:$0xff]  ;;  %v277_v5 = vpack.c.bf16 %v246_v4, %v245_v3 }
  0x23   :  { %v177_v43 = vpack.c.bf16 %v168_v40, %v167_v39  ;;  %v166_v44 = vld [vmem:[%s2109_s28 + $0x68] sm:$0xff]  ;;  %v163_v48 = vld [vmem:[%s2109_s28 + $0x50] sm:$0xff]  ;;  %v164_v49 = vld [vmem:[%s2109_s28 + $0x58] sm:$0xff] }
  0x24   :  { %119 = vmatpush.bf16.msra.mxu0 %v106_v14  ;;  %v176_v47 = vpack.c.bf16 %v166_v44, %v165_v41  ;;  %v175_v53 = vpack.c.bf16 %v164_v49, %v163_v48  ;;  %v161_v54 = vld [vmem:[%s2109_s28 + $0x40] sm:$0xff]  ;;  %v162_v55 = vld [vmem:[%s2109_s28 + $0x48] sm:$0xff]  ;;  %v159_v60 = vld [vmem:[%s2109_s28 + $0x30] sm:$0xff] }
  0x25   :  { %182 = vmatpush.bf16.msra.mxu2 %v177_v43  ;;  %v174_v59 = vpack.c.bf16 %v162_v55, %v161_v54  ;;  %v160_v61 = vld [vmem:[%s2109_s28 + $0x38] sm:$0xff]  ;;  %v247_v63 = vld [vmem:[%s2074_s11 + $0x20] sm:$0xff]  ;;  %v158_v10 = vld [vmem:[%s2109_s28 + $0x28] sm:$0xff] }
  0x26   :  { %v173_v1 = vpack.c.bf16 %v160_v61, %v159_v60  ;;  %v278_v2 = vpack.c.bf16 %v248_v0, %v247_v63  ;;  %v243_v6 = vld [vmem:[%s2074_s11] sm:$0xff]  ;;  %v155_v12 = vld [vmem:[%s2109_s28 + $0x10] sm:$0xff]  ;;  %v156_v13 = vld [vmem:[%s2109_s28 + $0x18] sm:$0xff] }
  0x27   :  { %v276_v8 = vpack.c.bf16 %v244_v7, %v243_v6  ;;  %v157_v9 = vld [vmem:[%s2109_s28 + $0x20] sm:$0xff]  ;;  %v171_v14 = vpack.c.bf16 %v156_v13, %v155_v12  ;;  %v154_v16 = vld [vmem:[%s2109_s28 + $0x8] sm:$0xff]  ;;  %v212_v19 = vld [vmem:[%s2110_s29 + $0x70] sm:$0xff] }
  0x28   :  { %120 = vmatpush.bf16.msra.mxu0 %v105_v17  ;;  %v172_v11 = vpack.c.bf16 %v158_v10, %v157_v9  ;;  %v153_v15 = vld [vmem:[%s2109_s28] sm:$0xff]  ;;  %v209_v29 = vld [vmem:[%s2110_s29 + $0x58] sm:$0xff]  ;;  %v204_v36 = vld [vmem:[%s2110_s29 + $0x30] sm:$0xff] }
  0x29   :  { %183 = vmatpush.bf16.msra.mxu2 %v176_v47  ;;  %v170_v17 = vpack.c.bf16 %v154_v16, %v153_v15  ;;  %v210_v21 = vld [vmem:[%s2110_s29 + $0x60] sm:$0xff]  ;;  %v205_v37 = vld [vmem:[%s2110_s29 + $0x38] sm:$0xff]  ;;  %v203_v40 = vld [vmem:[%s2110_s29 + $0x28] sm:$0xff] }
  0x2a   :  { %v202_v39 = vld [vmem:[%s2110_s29 + $0x20] sm:$0xff]  ;;  %v201_v43 = vld [vmem:[%s2110_s29 + $0x18] sm:$0xff]  ;;  %v199_v46 = vld [vmem:[%s2110_s29 + $0x8] sm:$0xff] }
  0x2b   :  { %v217_v41 = vpack.c.bf16 %v203_v40, %v202_v39  ;;  %v198_v45 = vld [vmem:[%s2110_s29] sm:$0xff]  ;;  %v273_v48 = vld [vmem:[%s2074_s11 + $0xf0] sm:$0xff]  ;;  %v274_v49 = vld [vmem:[%s2074_s11 + $0xf8] sm:$0xff] }
  0x2c   :  { %121 = vmatpush.bf16.msra.mxu0 %v104_v20  ;;  %v213_v20 = vld [vmem:[%s2110_s29 + $0x78] sm:$0xff]  ;;  %v215_v47 = vpack.c.bf16 %v199_v46, %v198_v45  ;;  %v291_v51 = vpack.c.bf16 %v274_v49, %v273_v48  ;;  %v272_v52 = vld [vmem:[%s2074_s11 + $0xe8] sm:$0xff]  ;;  %v269_v54 = vld [vmem:[%s2074_s11 + $0xd0] sm:$0xff] }
  0x2d   :  { %184 = vmatpush.bf16.msra.mxu2 %v175_v53  ;;  %v222_v22 = vpack.c.bf16 %v213_v20, %v212_v19  ;;  %v270_v55 = vld [vmem:[%s2074_s11 + $0xd8] sm:$0xff]  ;;  %v267_v57 = vld [vmem:[%s2074_s11 + $0xc0] sm:$0xff]  ;;  %v268_v58 = vld [vmem:[%s2074_s11 + $0xc8] sm:$0xff] }
  0x2e   :  { %v1137_v61 = vld [vmem:[%s2111_s4] ss:$0 sm:$0xff]  ;;  %v265_v4 = vld [vmem:[%s2074_s11 + $0xb0] sm:$0xff]  ;;  %v335_v16 = vld [vmem:[%s2076_s13 + $0x78] sm:$0xff]  ;;  %s2112_s4 = sld [smem:[#allocation8_spill]] }
  0x2f   :  { %227 = vmatpush.bf16.msra.mxu3 %v222_v22  ;;  %v263_v7 = vld [vmem:[%s2074_s11 + $0xa0] sm:$0xff]  ;;  %v261_v10 = vld [vmem:[%s2074_s11 + $0x90] sm:$0xff]  ;;  %v331_v20 = vld [vmem:[%s2076_s13 + $0x58] sm:$0xff] }
  0x30   :  { %122 = vmatpush.bf16.msra.mxu0 %v103_v23  ;;  %v211_v23 = vld [vmem:[%s2110_s29 + $0x68] sm:$0xff]  ;;  %v259_v13 = vld [vmem:[%s2074_s11 + $0x80] sm:$0xff]  ;;  %v756_v48 = vld [vmem:[%s2080_s17 + $0x58] sm:$0xff] }
  0x31   :  { %185 = vmatpush.bf16.msra.mxu2 %v174_v59  ;;  %v221_v25 = vpack.c.bf16 %v211_v23, %v210_v21  ;;  %v288_v59 = vpack.c.bf16 %v268_v58, %v267_v57  ;;  %v332_v19 = vld [vmem:[%s2076_s13 + $0x60] sm:$0xff]  ;;  %v330_v21 = vld [vmem:[%s2076_s13 + $0x50] sm:$0xff]  ;;  %v329_v22 = vld [vmem:[%s2076_s13 + $0x48] sm:$0xff] }
  0x32   :  { %v328_v23 = vld [vmem:[%s2076_s13 + $0x40] sm:$0xff]  ;;  %v750_v57 = vld [vmem:[%s2080_s17 + $0x28] sm:$0xff] }
  0x33   :  { %123 = vmatmul.bf16.vlgmr.msra.gmra.mxu0 %v102_v26  ;;  %228 = vmatpush.bf16.msra.mxu3 %v221_v25  ;;  %v326_v25 = vld [vmem:[%s2076_s13 + $0x30] sm:$0xff] }
  0x34   :  { %306 = vmatpush.bf16.msrb.mxu0 %v291_v51  ;;  %v754_v51 = vld [vmem:[%s2080_s17 + $0x48] sm:$0xff] }
  0x35   :  { %186 = vmatpush.bf16.msra.mxu2 %v173_v1 }
  0x39   :  { %187 = vmatpush.bf16.msra.mxu2 %v172_v11  ;;  %v262_v11 = vld [vmem:[%s2074_s11 + $0x98] sm:$0xff] }
  0x3a   :  { %v285_v12 = vpack.c.bf16 %v262_v11, %v261_v10  ;;  %v359_v11 = vld [vmem:[%s2075_s12] sm:$0xf] }
  0x3d   :  { %188 = vmatpush.bf16.msra.mxu2 %v171_v14  ;;  %v260_v14 = vld [vmem:[%s2074_s11 + $0x88] sm:$0xff] }
  0x3e   :  { %v284_v15 = vpack.c.bf16 %v260_v14, %v259_v13  ;;  %v1218_v14 = vmov 2  }
  0x41   :  { %189 = vmatpush.bf16.msra.mxu2 %v170_v17  ;;  %v334_v17 = vld [vmem:[%s2076_s13 + $0x70] sm:$0xff] }
  0x45   :  { %336 = vmatpush.msrb.mxu2 %v335_v16  ;;  %v82_v16 = vld [vmem:[%s2108_s8] sm:$0xff]   ;;  %s1220_s8 = smov 96  }
  0x47   :  { %337 = vmatpush.msrb.mxu2 %v334_v17 }
  0xb0   :  { %v124_v27 = vpop.f32.mrf.mxu0 }
  0xb1   :  { %v1417_v32 = vadd.f32 %v1136_v28, %v124_v27 }
  0xb8   :  { %v126_v31 = vpop.f32.mrf.mxu0 }
  0xb9   :  { %v1419_v33 = vadd.f32 %v1136_v28, %v126_v31  ;;  %v208_v28 = vld [vmem:[%s2110_s29 + $0x50] sm:$0xff] }
  0xba   :  { %v220_v31 = vpack.c.bf16 %v209_v29, %v208_v28  ;;  %v1138_v28 = vld [vmem:[%s2073_s10] ss:$0 sm:$0xff] }
  0xbb   :  { %v1423_v35 = vpack.c.bf16 %v1419_v33, %v1417_v32  ;;  %v324_v29 = vld [vmem:[%s2076_s13 + $0x20] sm:$0xff] }
  0xbc   :  { %229 = vmatpush.bf16.msra.mxu3 %v220_v31 }
  0xbd   :  { %146 = vmatpush.bf16.msra.mxu1 %v1423_v35 }
  0xc0   :  { %1110 = vmatmul.msk.bf16.vlgmr.msra.gmra.mxu1 %vm135_vm0, %v1120_v38  ;;  %v218_v38 = vpack.c.bf16 %v205_v37, %v204_v36  ;;  %v760_v36 = vld [vmem:[%s2080_s17 + $0x78] sm:$0xff] }
  0xc1   :  { %292 = vmatpush.bf16.msrb.mxu1 %v283_v34  ;;  %v206_v34 = vld [vmem:[%s2110_s29 + $0x40] sm:$0xff] }
  0xc5   :  { %293 = vmatpush.bf16.msrb.mxu1 %v282_v42  ;;  %v200_v42 = vld [vmem:[%s2110_s29 + $0x10] sm:$0xff] }
  0xc6   :  { %v216_v44 = vpack.c.bf16 %v201_v43, %v200_v42  ;;  %v757_v43 = vld [vmem:[%s2080_s17 + $0x60] sm:$0xff] }
  0xc9   :  { %294 = vmatpush.bf16.msrb.mxu1 %v281_v50  ;;  %v271_v50 = vld [vmem:[%s2074_s11 + $0xe0] sm:$0xff] }
  0xca   :  { %v290_v53 = vpack.c.bf16 %v272_v52, %v271_v50  ;;  %v753_v50 = vld [vmem:[%s2080_s17 + $0x40] sm:$0xff] }
  0xcb   :  { %v765_v52 = vpack.c.bf16 %v754_v51, %v753_v50 }
  0xcc   :  { %307 = vmatpush.bf16.msrb.mxu0 %v290_v53  ;;  %v751_v53 = vld [vmem:[%s2080_s17 + $0x30] sm:$0xff] }
  0xcd   :  { %295 = vmatpush.bf16.msrb.mxu1 %v280_v56  ;;  %v289_v56 = vpack.c.bf16 %v270_v55, %v269_v54  ;;  %v752_v54 = vld [vmem:[%s2080_s17 + $0x38] sm:$0xff] }
  0xce   :  { %v764_v55 = vpack.c.bf16 %v752_v54, %v751_v53 }
  0xd0   :  { %308 = vmatpush.bf16.msrb.mxu0 %v289_v56  ;;  %v749_v56 = vld [vmem:[%s2080_s17 + $0x20] sm:$0xff] }
  0xd1   :  { %296 = vmatpush.bf16.msrb.mxu1 %v279_v62  ;;  %v763_v58 = vpack.c.bf16 %v750_v57, %v749_v56 }
  0xd4   :  { %309 = vmatpush.bf16.msrb.mxu0 %v288_v59  ;;  %v747_v59 = vld [vmem:[%s2080_s17 + $0x10] sm:$0xff] }
  0xd5   :  { %297 = vmatpush.bf16.msrb.mxu1 %v278_v2 }
  0xd9   :  { %298 = vmatpush.bf16.msrb.mxu1 %v277_v5  ;;  %v266_v5 = vld [vmem:[%s2074_s11 + $0xb8] sm:$0xff] }
  0xda   :  { %v287_v6 = vpack.c.bf16 %v266_v5, %v265_v4  ;;  %v1215_v4 = vmov 3   ;;  %v1216_v5 = vmov 1  }
  0xdb   :  { %1132 = vset.pattern.permute.xlu2 %v1215_v4  ;;  %1130 = vset.pattern.permute.xlu0 %v1216_v5 }
  0xdc   :  { %310 = vmatpush.bf16.msrb.mxu0 %v287_v6  ;;  %v1217_v6 = vmov 0  }
  0xdd   :  { %299 = vmatpush.bf16.msrb.mxu1 %v276_v8  ;;  %v264_v8 = vld [vmem:[%s2074_s11 + $0xa8] sm:$0xff]  ;;  %1131 = vset.pattern.permute.xlu1 %v1217_v6 }
  0xde   :  { %v286_v9 = vpack.c.bf16 %v264_v8, %v263_v7 }
  0xe0   :  { %300 = vmatmul.bf16.vlgmr.msrb.gmra.mxu1 %v1423_v35  ;;  %311 = vmatpush.bf16.msrb.mxu0 %v286_v9 }
  0xe4   :  { %312 = vmatpush.bf16.msrb.mxu0 %v285_v12 }
  0xe8   :  { %313 = vmatpush.bf16.msrb.mxu0 %v284_v15  ;;  %v380_v15 = vlaneseq }
 0x13d   :  { %v148_v18 = vpop.f32.mrf.mxu1 }
 0x13e   :  { %v149_v26 = vadd.f32 %v148_v18, %v1417_v32  ;;  %v207_v32 = vld [vmem:[%s2110_s29 + $0x48] sm:$0xff] }
 0x13f   :  { %v333_v18 = vld [vmem:[%s2076_s13 + $0x68] sm:$0xff] }
 0x140   :  { %338 = vmatpush.msrb.mxu2 %v333_v18  ;;  %v381_v18 = vshrl.u32 %v380_v15, 7 }
 0x142   :  { %339 = vmatpush.msrb.mxu2 %v332_v19  ;;  %v384_v19 = vand.u32 127, %v380_v15 }
 0x144   :  { %340 = vmatpush.msrb.mxu2 %v331_v20  ;;  %v385_v20 = vunpack.c.l.bf16 %v82_v16  ;;  %vm389_vm2 = vcmp.eq.s32.totalorder %v381_v18, %v384_v19 }
 0x145   :  { %v150_v24 = vpop.f32.mrf.mxu1 }
 0x146   :  { %v151_v27 = vadd.f32 %v150_v24, %v1419_v33  ;;  %v219_v33 = vpack.c.bf16 %v207_v32, %v206_v34  ;;  %341 = vmatpush.msrb.mxu2 %v330_v21  ;;  %v327_v24 = vld [vmem:[%s2076_s13 + $0x38] sm:$0xff]  ;;  %v322_v34 = vld [vmem:[%s2076_s13 + $0x10] sm:$0xff]  ;;  %vm387_vm1 = vcmp.gt.f32.partialorder %v385_v20, 0.0 }
 0x147   :  { %vm391_vm3 = vmor %vm387_vm1, %vm389_vm2  ;;  %vm671_vm1 = vcmask 523264   ;;  %vm674_vm2 = vcmask 785408  }
 0x148   :  { %v169_v30 = vpack.c.bf16 %v151_v27, %v149_v26  ;;  %230 = vmatpush.bf16.msra.mxu3 %v219_v33  ;;  %342 = vmatpush.msrb.mxu2 %v329_v22  ;;  %v325_v27 = vld [vmem:[%s2076_s13 + $0x28] sm:$0xff]  ;;  %v759_v33 = vld [vmem:[%s2080_s17 + $0x70] sm:$0xff] }
 0x149   :  { %v768_v42 = vpack.c.bf16 %v760_v36, %v759_v33  ;;  %v1219_v33 = vmov -1e+30  }
 0x14a   :  { %190 = vmatmul.bf16.vlgmr.msra.gmra.mxu2 %v169_v30  ;;  %v323_v30 = vld [vmem:[%s2076_s13 + $0x18] sm:$0xff]  ;;  %v393_v36 = vsel %vm391_vm3, 0.0, %v1219_v33  ;;  %vm913_vm3 = vcmask 64512  }
 0x14b   :  { %343 = vmatpush.msrb.mxu2 %v328_v23 }
 0x14c   :  { %231 = vmatpush.bf16.msra.mxu3 %v218_v38  ;;  %v321_v38 = vld [vmem:[%s2076_s13 + $0x8] sm:$0xff] }
 0x14d   :  { %344 = vmatpush.msrb.mxu2 %v327_v24 }
 0x14f   :  { %345 = vmatpush.msrb.mxu2 %v326_v25 }
 0x150   :  { %232 = vmatpush.bf16.msra.mxu3 %v217_v41  ;;  %v320_v41 = vld [vmem:[%s2076_s13] sm:$0xff] }
 0x151   :  { %346 = vmatpush.msrb.mxu2 %v325_v27 }
 0x153   :  { %347 = vmatpush.msrb.mxu2 %v324_v29 }
 0x154   :  { %233 = vmatpush.bf16.msra.mxu3 %v216_v44  ;;  %v758_v44 = vld [vmem:[%s2080_s17 + $0x68] sm:$0xff] }
 0x155   :  { %348 = vmatpush.msrb.mxu2 %v323_v30  ;;  %v767_v46 = vpack.c.bf16 %v758_v44, %v757_v43 }
 0x157   :  { %349 = vmatpush.msrb.mxu2 %v322_v34  ;;  %v382_v34 = vadd.s32 8, %v381_v18 }
 0x158   :  { %234 = vmatpush.bf16.msra.mxu3 %v215_v47  ;;  %v755_v47 = vld [vmem:[%s2080_s17 + $0x50] sm:$0xff] }
 0x159   :  { %350 = vmatpush.msrb.mxu2 %v321_v38  ;;  %v766_v49 = vpack.c.bf16 %v756_v48, %v755_v47  ;;  %vm390_vm8 = vcmp.eq.s32.totalorder %v382_v34, %v384_v19 }
 0x15b   :  { %351 = vmatpush.msrb.mxu2 %v320_v41 }
 0x15d   :  { %773 = vmatpush.bf16.msra.mxu2 %v768_v42 }
 0x161   :  { %774 = vmatpush.bf16.msra.mxu2 %v767_v46 }
 0x165   :  { %775 = vmatpush.bf16.msra.mxu2 %v766_v49 }
 0x169   :  { %776 = vmatpush.bf16.msra.mxu2 %v765_v52 }
 0x16d   :  { %777 = vmatpush.bf16.msra.mxu2 %v764_v55 }
 0x171   :  { %778 = vmatpush.bf16.msra.mxu2 %v763_v58 }
 0x1cd   :  { %v191_v60 = vpop.f32.mrf.mxu2 }
 0x1ce   :  { %v192_v62 = vadd.f32 %v1137_v61, %v191_v60  ;;  %v748_v60 = vld [vmem:[%s2080_s17 + $0x18] sm:$0xff] }
 0x1d0   :  { %v196_v1 = vmax.f32 %v192_v62, 0.0  ;;  %v745_v62 = vld [vmem:[%s2080_s17] sm:$0xff] }
 0x1d5   :  { %v193_v63 = vpop.f32.mrf.mxu2 }
 0x1d6   :  { %v194_v0 = vadd.f32 %v1137_v61, %v193_v63  ;;  %v762_v61 = vpack.c.bf16 %v748_v60, %v747_v59  ;;  %v746_v63 = vld [vmem:[%s2080_s17 + $0x8] sm:$0xff]  ;;  %s2114_s17 = sld [smem:[#allocation7_spill]] }
 0x1d8   :  { %v197_v2 = vmax.f32 %v194_v0, 0.0  ;;  %779 = vmatpush.bf16.msra.mxu2 %v762_v61  ;;  %v761_v0 = vpack.c.bf16 %v746_v63, %v745_v62 }
 0x1da   :  { %v214_v3 = vpack.c.bf16 %v197_v2, %v196_v1  ;;  %v301_v1 = vpop.f32.mrf.mxu1 }
 0x1dc   :  { %235 = vmatmul.bf16.vlgmr.msra.gmra.mxu3 %v214_v3  ;;  %780 = vmatpush.bf16.msra.mxu2 %v761_v0 }
 0x1e2   :  { %v303_v7 = vpop.f32.mrf.mxu1 }
 0x25f   :  { %v236_v26 = vpop.f32.mrf.mxu3 }
 0x260   :  { %v237_v31 = vadd.f32 %v1138_v28, %v236_v26 }
 0x262   :  { %v241_v39 = vmax.f32 %v237_v31, 0.0 }
 0x267   :  { %v238_v32 = vpop.f32.mrf.mxu3 }
 0x268   :  { %v239_v37 = vadd.f32 %v1138_v28, %v238_v32  ;;  %v386_v32 = vunpack.c.h.bf16 %v82_v16 }
 0x26a   :  { %v242_v40 = vmax.f32 %v239_v37, 0.0  ;;  %vm388_vm7 = vcmp.gt.f32.partialorder %v386_v32, 0.0 }
 0x26b   :  { %vm392_vm9 = vmor %vm388_vm7, %vm390_vm8 }
 0x26c   :  { %v1685_v45 = vpack.c.bf16 %v242_v40, %v241_v39  ;;  %v394_v56 = vsel %vm392_vm9, 0.0, %v1219_v33 }
 0x26e   :  { %314 = vmatmul.bf16.vlgmr.msrb.gmra.mxu0 %v1685_v45 }
 0x2eb   :  { %v315_v2 = vpop.f32.mrf.mxu0 }
 0x2ec   :  { %v316_v3 = vadd.f32 %v315_v2, %v301_v1 }
 0x2ee   :  { %352 = vmatmul.f32.vlgmr.msrb.gmra.mxu2 %v316_v3 }
 0x2f3   :  { %v317_v8 = vpop.f32.mrf.mxu0 }
 0x2f4   :  { %v318_v9 = vadd.f32 %v317_v8, %v303_v7 }
 0x2f6   :  { %v1724_v10 = vpack.c.bf16 %v318_v9, %v316_v3  ;;  %355 = vmatmul.f32.gmra.mxu2 %v318_v9  ;;  %374 = vmatpush.xpose.msrb.mxu3 %v318_v9 }
 0x2f8   :  { %450 = vmatpush.bf16.msra.mxu1 %v1724_v10 }
 0x2fa   :  { %375 = vmatpush.xpose.msrb.mxu3 %v316_v3 }
 0x2fd   :  { %376 = vmatmul.f32.vlgmr.msrb.gmra.mxu3 %v359_v11 }
 0x2fe   :  { %781 = vmatmul.bf16.vlgmr.msra.gmra.mxu2 %v1423_v35 }
 0x30e   :  { %786 = vmatmul.bf16.gmra.mxu2 %v1685_v45 }
 0x371   :  { %v353_v12 = vpop.f32.mrf.mxu2 }
 0x372   :  { %583 = vperm.xlu2 %1132, %v353_v12   ;;  %397 = vperm.xlu1 %1131, %v353_v12  }
 0x373   :  { %458 = vperm.xlu0 %1130, %v353_v12  }
 0x379   :  { %v356_v13 = vpop.f32.mrf.mxu2 }
 0x37a   :  { %587 = vperm.xlu2 %1132, %v356_v13   ;;  %402 = vperm.xlu1 %1131, %v356_v13  }
 0x37b   :  { %462 = vperm.xlu0 %1130, %v356_v13  }
 0x380   :  { %v1735_v17 = vpop.f32.mrf.mxu3 }
 0x381   :  { %v405_v22 = vperm.slane %v1735_v17, 0  ;;  %v590_v23 = vperm.slane %v1735_v17, 3  ;;  %v465_v24 = vperm.slane %v1735_v17, 1  ;;  %v528_v59 = vperm.slane %v1735_v17, 2 }
 0x382   :  { %1134 = vset.pattern.permute.xlu1 %v1218_v14 }
 0x383   :  { %1133 = vset.pattern.permute.xlu0 %v1218_v14  ;;  %525 = vperm.xlu1 %1134, %v356_v13  }
 0x384   :  { %521 = vperm.xlu0 %1133, %v353_v12  }
 0x38c   :  { %1135 = vset.pattern.permute.xlu0 %v1215_v4 }
 0x3cc   :  { %v584_v21 = vpop.permute.xlu2 %583 }
 0x3cd   :  { %v591_v28 = vadd.f32 %v590_v23, %v584_v21 }
 0x3cf   :  { %v595_v38 = vmul.f32 0.2, %v591_v28  ;;  %vm593_vm6 = vcmp.gt.f32.partialorder %v591_v28, 0.0 }
 0x3d1   :  { %v597_v51 = vsel %vm593_vm6, %v591_v28, %v595_v38 }
 0x3d2   :  { %v599_v53 = vadd.f32 %v597_v51, %v393_v36 }
 0x3d4   :  { %v588_v41 = vpop.permute.xlu2 %587  ;;  %v601_v62 = vsel %vm135_vm0, %v599_v53, -inf }
 0x3d5   :  { %v592_v48 = vadd.f32 %v590_v23, %v588_v41 }
 0x3d7   :  { %v596_v54 = vmul.f32 0.2, %v592_v48  ;;  %vm594_vm11 = vcmp.gt.f32.partialorder %v592_v48, 0.0 }
 0x3d9   :  { %v598_v1 = vsel %vm594_vm11, %v592_v48, %v596_v54 }
 0x3da   :  { %v600_v5 = vadd.f32 %v598_v1, %v394_v56 }
 0x3dc   :  { %v604_v11 = vsel %vm135_vm0, %v600_v5, -inf }
 0x3e4   :  { %v398_v25 = vpop.permute.xlu1 %397 }
 0x3e5   :  { %v406_v26 = vadd.f32 %v405_v22, %v398_v25  ;;  %v459_v27 = vpop.permute.xlu0 %458 }
 0x3e6   :  { %v466_v29 = vadd.f32 %v465_v24, %v459_v27 }
 0x3e7   :  { %vm408_vm4 = vcmp.gt.f32.partialorder %v406_v26, 0.0  ;;  %v410_v30 = vmul.f32 0.2, %v406_v26 }
 0x3e8   :  { %vm468_vm5 = vcmp.gt.f32.partialorder %v466_v29, 0.0  ;;  %v470_v31 = vmul.f32 0.2, %v466_v29 }
 0x3e9   :  { %v412_v37 = vsel %vm408_vm4, %v406_v26, %v410_v30 }
 0x3ea   :  { %v472_v39 = vsel %vm468_vm5, %v466_v29, %v470_v31  ;;  %v414_v40 = vadd.f32 %v412_v37, %v393_v36 }
 0x3eb   :  { %v474_v42 = vadd.f32 %v472_v39, %v393_v36 }
 0x3ec   :  { %v403_v43 = vpop.permute.xlu1 %402  ;;  %v416_v44 = vsel %vm135_vm0, %v414_v40, -inf }
 0x3ed   :  { %v463_v46 = vpop.permute.xlu0 %462  ;;  %v476_v47 = vsel %vm135_vm0, %v474_v42, -inf  ;;  %417 = vmax.xlane.f32.xlu0 %v416_v44  ;;  %v407_v49 = vadd.f32 %v405_v22, %v403_v43 }
 0x3ee   :  { %v467_v50 = vadd.f32 %v465_v24, %v463_v46  ;;  %477 = vmax.xlane.f32.xlu2 %v476_v47 }
 0x3ef   :  { %v411_v55 = vmul.f32 0.2, %v407_v49  ;;  %vm409_vm12 = vcmp.gt.f32.partialorder %v407_v49, 0.0 }
 0x3f0   :  { %vm469_vm10 = vcmp.gt.f32.partialorder %v467_v50, 0.0  ;;  %v471_v52 = vmul.f32 0.2, %v467_v50 }
 0x3f1   :  { %v413_v2 = vsel %vm409_vm12, %v407_v49, %v411_v55 }
 0x3f2   :  { %v473_v57 = vsel %vm469_vm10, %v467_v50, %v471_v52  ;;  %v415_v6 = vadd.f32 %v413_v2, %v394_v56 }
 0x3f3   :  { %v475_v58 = vadd.f32 %v473_v57, %v394_v56 }
 0x3f4   :  { %v419_v12 = vsel %vm135_vm0, %v415_v6, -inf }
 0x3f5   :  { %v526_v60 = vpop.permute.xlu1 %525  ;;  %v479_v61 = vsel %vm135_vm0, %v475_v58, -inf }
 0x3f6   :  { %v530_v63 = vadd.f32 %v528_v59, %v526_v60  ;;  %480 = vmax.xlane.f32.xlu1 %v479_v61  ;;  %v522_v0 = vpop.permute.xlu0 %521  ;;  %602 = vmax.xlane.f32.xlu2 %v601_v62 }
 0x3f7   :  { %v529_v3 = vadd.f32 %v528_v59, %v522_v0 }
 0x3f8   :  { %vm532_vm13 = vcmp.gt.f32.partialorder %v530_v63, 0.0  ;;  %v534_v4 = vmul.f32 0.2, %v530_v63 }
 0x3f9   :  { %v533_v7 = vmul.f32 0.2, %v529_v3  ;;  %vm531_vm14 = vcmp.gt.f32.partialorder %v529_v3, 0.0 }
 0x3fa   :  { %v536_v8 = vsel %vm532_vm13, %v530_v63, %v534_v4 }
 0x3fb   :  { %v538_v9 = vadd.f32 %v536_v8, %v394_v56  ;;  %v535_v14 = vsel %vm531_vm14, %v529_v3, %v533_v7 }
 0x3fc   :  { %v537_v15 = vadd.f32 %v535_v14, %v393_v36 }
 0x3fd   :  { %v542_v13 = vsel %vm135_vm0, %v538_v9, -inf }
 0x3fe   :  { %605 = vmax.xlane.f32.xlu1 %v604_v11  ;;  %420 = vmax.xlane.f32.xlu2 %v419_v12  ;;  %v539_v16 = vsel %vm135_vm0, %v537_v15, -inf }
 0x3ff   :  { %543 = vmax.xlane.f32.xlu0 %v542_v13 }
 0x406   :  { %540 = vmax.xlane.f32.xlu2 %v539_v16 }
 0x460   :  { %v418_v17 = vpop.xlane.xlu0 %417 }
 0x461   :  { %v478_v18 = vpop.xlane.xlu2 %477  ;;  %v422_v19 = vsub.f32 %v414_v40, %v418_v17 }
 0x462   :  { %v482_v20 = vsub.f32 %v474_v42, %v478_v18 }
 0x463   :  { %v424_v21 = vmul.f32 1.442695, %v422_v19 }
 0x464   :  { %v484_v22 = vmul.f32 1.442695, %v482_v20 }
 0x465   :  { %1145 = vpow2.f32 %v424_v21  ;;  %v806_v21 = vld [vmem:[%s2082_s19 + $0x70] sm:$0xff] }
 0x466   :  { %1147 = vpow2.f32 %v484_v22  ;;  %v807_v22 = vld [vmem:[%s2082_s19 + $0x78] sm:$0xff] }
 0x469   :  { %v481_v23 = vpop.xlane.xlu1 %480  ;;  %v603_v24 = vpop.xlane.xlu2 %602 }
 0x46a   :  { %v483_v25 = vsub.f32 %v475_v58, %v481_v23  ;;  %v607_v26 = vsub.f32 %v599_v53, %v603_v24 }
 0x46b   :  { %v1749_v27 = vpop.eup %1145 }
 0x46c   :  { %v1148_v28 = vpop.eup %1147  ;;  %v486_v29 = vmul.f32 1.442695, %v483_v25  ;;  %v609_v30 = vmul.f32 1.442695, %v607_v26  ;;  %v428_v31 = vsel %vm135_vm0, %v1749_v27, 0.0  ;;  %v815_v25 = vpack.c.bf16 %v807_v22, %v806_v21  ;;  %v804_v26 = vld [vmem:[%s2082_s19 + $0x60] sm:$0xff] }
 0x46d   :  { %v488_v34 = vsel %vm135_vm0, %v1148_v28, 0.0  ;;  %429 = vadd.xlane.f32.xlu0 %v428_v31  ;;  %v697_v22 = vld [vmem:[%s2112_s4 + $0x60] sm:$0xff] }
 0x46e   :  { %1149 = vpow2.f32 %v486_v29  ;;  %489 = vadd.xlane.f32.xlu1 %v488_v34  ;;  %v802_v34 = vld [vmem:[%s2082_s19 + $0x50] sm:$0xff] }
 0x46f   :  { %1151 = vpow2.f32 %v609_v30 }
 0x471   :  { %v421_v32 = vpop.xlane.xlu2 %420  ;;  %v606_v33 = vpop.xlane.xlu1 %605 }
 0x472   :  { %v423_v36 = vsub.f32 %v415_v6, %v421_v32  ;;  %v608_v40 = vsub.f32 %v600_v5, %v606_v33  ;;  %v544_v46 = vpop.xlane.xlu0 %543  ;;  %v803_v32 = vld [vmem:[%s2082_s19 + $0x58] sm:$0xff] }
 0x473   :  { %v546_v50 = vsub.f32 %v538_v9, %v544_v46  ;;  %v813_v33 = vpack.c.bf16 %v803_v32, %v802_v34  ;;  %v794_v46 = vld [vmem:[%s2082_s19 + $0x10] sm:$0xff]  ;;  %v690_v32 = vld [vmem:[%s2112_s4 + $0x28] sm:$0xff] }
 0x474   :  { %v1150_v37 = vpop.eup %1149  ;;  %v426_v38 = vmul.f32 1.442695, %v423_v36  ;;  %v611_v43 = vmul.f32 1.442695, %v608_v40  ;;  %v800_v36 = vld [vmem:[%s2082_s19 + $0x40] sm:$0xff]  ;;  %v799_v40 = vld [vmem:[%s2082_s19 + $0x38] sm:$0xff] }
 0x475   :  { %v1754_v39 = vpop.eup %1151  ;;  %v491_v41 = vsel %vm135_vm0, %v1150_v37, 0.0  ;;  %v549_v52 = vmul.f32 1.442695, %v546_v50  ;;  %v793_v50 = vld [vmem:[%s2082_s19 + $0x8] sm:$0xff] }
 0x476   :  { %492 = vadd.xlane.f32.xlu2 %v491_v41  ;;  %v613_v42 = vsel %vm135_vm0, %v1754_v39, 0.0  ;;  %1153 = vpow2.f32 %v426_v38 }
 0x477   :  { %614 = vadd.xlane.f32.xlu0 %v613_v42  ;;  %1155 = vpow2.f32 %v611_v43  ;;  %v796_v42 = vld [vmem:[%s2082_s19 + $0x20] sm:$0xff]  ;;  %v797_v43 = vld [vmem:[%s2082_s19 + $0x28] sm:$0xff] }
 0x479   :  { %v541_v44 = vpop.xlane.xlu2 %540 }
 0x47a   :  { %v545_v47 = vsub.f32 %v537_v15, %v541_v44  ;;  %v810_v44 = vpack.c.bf16 %v797_v43, %v796_v42 }
 0x47c   :  { %v547_v48 = vmul.f32 1.442695, %v545_v47  ;;  %v1154_v49 = vpop.eup %1153  ;;  %v795_v47 = vld [vmem:[%s2082_s19 + $0x18] sm:$0xff] }
 0x47d   :  { %v431_v51 = vsel %vm135_vm0, %v1154_v49, 0.0  ;;  %v1156_v53 = vpop.eup %1155 }
 0x47e   :  { %1157 = vpow2.f32 %v547_v48  ;;  %432 = vadd.xlane.f32.xlu1 %v431_v51  ;;  %v616_v56 = vsel %vm135_vm0, %v1156_v53, 0.0  ;;  %v809_v48 = vpack.c.bf16 %v795_v47, %v794_v46 }
 0x47f   :  { %1159 = vpow2.f32 %v549_v52 }
 0x484   :  { %v1158_v54 = vpop.eup %1157 }
 0x485   :  { %v551_v55 = vsel %vm135_vm0, %v1158_v54, 0.0  ;;  %v1160_v57 = vpop.eup %1159 }
 0x486   :  { %552 = vadd.xlane.f32.xlu0 %v551_v55  ;;  %617 = vadd.xlane.f32.xlu1 %v616_v56  ;;  %v554_v58 = vsel %vm135_vm0, %v1160_v57, 0.0 }
 0x48e   :  { %500 = vrot.lane.b32.xlu2 %v1724_v10, %s1220_s8  ;;  %555 = vadd.xlane.f32.xlu1 %v554_v58 }
 0x49a   :  { %624 = vrot.lane.b32.xlu0 %v1724_v10, %s1221_s2 }
 0x4a7   :  { %562 = vrot.lane.b32.xlu1 %v1724_v10, %s1222_s30 }
 0x4e0   :  { %v430_v62 = vpop.xlane.xlu0 %429 }
 0x4e1   :  { %v490_v59 = vpop.xlane.xlu1 %489 }
 0x4e2   :  { %1161 = vrcp.f32 %v490_v59  ;;  %v717_v59 = vld [vmem:[%s2078_s15 + $0x78] sm:$0xff] }
 0x4e8   :  { %v1162_v61 = vpop.eup %1161 }
 0x4e9   :  { %v493_v60 = vpop.xlane.xlu2 %492  ;;  %v496_v0 = vmul.f32 %v1162_v61, %v1148_v28  ;;  %v714_v61 = vld [vmem:[%s2078_s15 + $0x60] sm:$0xff] }
 0x4ea   :  { %1163 = vrcp.f32 %v493_v60  ;;  %v615_v8 = vpop.xlane.xlu0 %614 }
 0x4eb   :  { %1165 = vrcp.f32 %v430_v62  ;;  %v715_v62 = vld [vmem:[%s2078_s15 + $0x68] sm:$0xff] }
 0x4f0   :  { %v1164_v63 = vpop.eup %1163 }
 0x4f1   :  { %v497_v1 = vmul.f32 %v1164_v63, %v1150_v37  ;;  %v501_v2 = vpop.permute.xlu2 %500  ;;  %v433_v3 = vpop.xlane.xlu1 %432  ;;  %v801_v37 = vld [vmem:[%s2082_s19 + $0x48] sm:$0xff]  ;;  %v725_v63 = vpack.c.bf16 %v715_v62, %v714_v61 }
 0x4f2   :  { %513 = vmatpush.bf16.msra.mxu3 %v501_v2  ;;  %1167 = vrcp.f32 %v433_v3  ;;  %v1166_v5 = vpop.eup %1165  ;;  %v812_v38 = vpack.c.bf16 %v801_v37, %v800_v36  ;;  %v710_v3 = vld [vmem:[%s2078_s15 + $0x40] sm:$0xff] }
 0x4f3   :  { %v498_v4 = vpack.c.bf16 %v497_v1, %v496_v0  ;;  %v436_v10 = vmul.f32 %v1166_v5, %v1749_v27  ;;  %v805_v27 = vld [vmem:[%s2082_s19 + $0x68] sm:$0xff]  ;;  %v712_v0 = vld [vmem:[%s2078_s15 + $0x50] sm:$0xff]  ;;  %v713_v1 = vld [vmem:[%s2078_s15 + $0x58] sm:$0xff] }
 0x4f4   :  { %v814_v31 = vpack.c.bf16 %v805_v27, %v804_v26  ;;  %v724_v2 = vpack.c.bf16 %v713_v1, %v712_v0  ;;  %v693_v26 = vld [vmem:[%s2112_s4 + $0x40] sm:$0xff] }
 0x4f5   :  { %1112 = vmatmul.msk.bf16.vlgmr.msra.gmra.mxu3 %vm135_vm0, %v498_v4  ;;  %v711_v4 = vld [vmem:[%s2078_s15 + $0x48] sm:$0xff]  ;;  %v1141_v36 = vld [vmem:[%s2077_s14] ss:$0 sm:$0xff] }
 0x4f6   :  { %v723_v5 = vpack.c.bf16 %v711_v4, %v710_v3  ;;  %v689_v37 = vld [vmem:[%s2112_s4 + $0x20] sm:$0xff] }
 0x4f8   :  { %v1168_v6 = vpop.eup %1167 }
 0x4f9   :  { %v437_v7 = vmul.f32 %v1168_v6, %v1154_v49  ;;  %v618_v11 = vpop.xlane.xlu1 %617  ;;  %v553_v12 = vpop.xlane.xlu0 %552  ;;  %v792_v49 = vld [vmem:[%s2082_s19] sm:$0xff]  ;;  %v708_v6 = vld [vmem:[%s2078_s15 + $0x30] sm:$0xff] }
 0x4fa   :  { %1169 = vrcp.f32 %v618_v11  ;;  %v808_v51 = vpack.c.bf16 %v793_v50, %v792_v49 }
 0x4fb   :  { %v438_v9 = vpack.c.bf16 %v437_v7, %v436_v10  ;;  %1171 = vrcp.f32 %v615_v8  ;;  %v709_v10 = vld [vmem:[%s2078_s15 + $0x38] sm:$0xff]  ;;  %v706_v8 = vld [vmem:[%s2078_s15 + $0x20] sm:$0xff] }
 0x4fc   :  { %v722_v7 = vpack.c.bf16 %v709_v10, %v708_v6 }
 0x4fd   :  { %1111 = vmatmul.msk.bf16.vlgmr.msra.gmra.mxu1 %vm135_vm0, %v438_v9  ;;  %v707_v9 = vld [vmem:[%s2078_s15 + $0x28] sm:$0xff] }
 0x4fe   :  { %v721_v11 = vpack.c.bf16 %v707_v9, %v706_v8 }
 0x500   :  { %v1170_v13 = vpop.eup %1169 }
 0x501   :  { %v1172_v14 = vpop.eup %1171  ;;  %v622_v15 = vmul.f32 %v1170_v13, %v1156_v53  ;;  %v556_v17 = vpop.xlane.xlu1 %555  ;;  %v705_v13 = vld [vmem:[%s2078_s15 + $0x18] sm:$0xff] }
 0x502   :  { %v621_v16 = vmul.f32 %v1172_v14, %v1754_v39  ;;  %1173 = vrcp.f32 %v556_v17  ;;  %v798_v39 = vld [vmem:[%s2082_s19 + $0x30] sm:$0xff] }
 0x503   :  { %1175 = vrcp.f32 %v553_v12  ;;  %v811_v41 = vpack.c.bf16 %v799_v40, %v798_v39  ;;  %v704_v12 = vld [vmem:[%s2078_s15 + $0x10] sm:$0xff]  ;;  %v688_v40 = vld [vmem:[%s2112_s4 + $0x18] sm:$0xff] }
 0x504   :  { %v623_v19 = vpack.c.bf16 %v622_v15, %v621_v16  ;;  %v720_v14 = vpack.c.bf16 %v705_v13, %v704_v12  ;;  %v702_v15 = vld [vmem:[%s2078_s15] sm:$0xff]  ;;  %v703_v16 = vld [vmem:[%s2078_s15 + $0x8] sm:$0xff]  ;;  %v996_v12 = vld [vmem:[%s2084_s21 + $0x70] sm:$0xff] }
 0x505   :  { %v719_v17 = vpack.c.bf16 %v703_v16, %v702_v15  ;;  %v997_v13 = vld [vmem:[%s2084_s21 + $0x78] sm:$0xff] }
 0x508   :  { %v1174_v20 = vpop.eup %1173 }
 0x509   :  { %v1176_v23 = vpop.eup %1175  ;;  %v560_v24 = vmul.f32 %v1174_v20, %v1160_v57  ;;  %v698_v20 = vld [vmem:[%s2112_s4 + $0x68] sm:$0xff] }
 0x50a   :  { %v559_v28 = vmul.f32 %v1176_v23, %v1158_v54  ;;  %v696_v23 = vld [vmem:[%s2112_s4 + $0x58] sm:$0xff] }
 0x50c   :  { %v625_v18 = vpop.permute.xlu0 %624  ;;  %v561_v30 = vpack.c.bf16 %v560_v24, %v559_v28  ;;  %v695_v24 = vld [vmem:[%s2112_s4 + $0x50] sm:$0xff]  ;;  %v692_v28 = vld [vmem:[%s2112_s4 + $0x38] sm:$0xff] }
 0x50d   :  { %637 = vmatpush.bf16.msrb.mxu3 %v625_v18  ;;  %v700_v18 = vld [vmem:[%s2112_s4 + $0x78] sm:$0xff] }
 0x50e   :  { %868 = vmatpush.msrb.mxu2 %v700_v18 }
 0x510   :  { %1114 = vmatmul.msk.bf16.vlgmr.msrb.gmra.mxu3 %vm135_vm0, %v623_v19  ;;  %v699_v19 = vld [vmem:[%s2112_s4 + $0x70] sm:$0xff] }
 0x511   :  { %841 = vmatpush.msra.mxu3 %v700_v18  ;;  %869 = vmatpush.msrb.mxu2 %v699_v19  ;;  %v995_v18 = vld [vmem:[%s2084_s21 + $0x68] sm:$0xff] }
 0x513   :  { %842 = vmatpush.msra.mxu3 %v699_v19  ;;  %870 = vmatpush.msrb.mxu2 %v698_v20 }
 0x515   :  { %843 = vmatpush.msra.mxu3 %v698_v20  ;;  %871 = vmatpush.msrb.mxu2 %v697_v22 }
 0x517   :  { %844 = vmatpush.msra.mxu3 %v697_v22  ;;  %872 = vmatpush.msrb.mxu2 %v696_v23 }
 0x519   :  { %v563_v29 = vpop.permute.xlu1 %562  ;;  %845 = vmatpush.msra.mxu3 %v696_v23  ;;  %873 = vmatpush.msrb.mxu2 %v695_v24 }
 0x51a   :  { %575 = vmatpush.bf16.msrb.mxu1 %v563_v29 }
 0x51b   :  { %846 = vmatpush.msra.mxu3 %v695_v24  ;;  %v992_v24 = vld [vmem:[%s2084_s21 + $0x50] sm:$0xff] }
 0x51d   :  { %1113 = vmatmul.msk.bf16.vlgmr.msrb.gmra.mxu1 %vm135_vm0, %v561_v30  ;;  %v691_v30 = vld [vmem:[%s2112_s4 + $0x30] sm:$0xff] }
 0x51e   :  { %820 = vmatpush.bf16.msra.mxu1 %v815_v25  ;;  %v694_v25 = vld [vmem:[%s2112_s4 + $0x48] sm:$0xff] }
 0x51f   :  { %847 = vmatpush.msra.mxu3 %v694_v25  ;;  %874 = vmatpush.msrb.mxu2 %v694_v25  ;;  %v993_v25 = vld [vmem:[%s2084_s21 + $0x58] sm:$0xff] }
 0x521   :  { %848 = vmatpush.msra.mxu3 %v693_v26  ;;  %875 = vmatpush.msrb.mxu2 %v693_v26 }
 0x522   :  { %821 = vmatpush.bf16.msra.mxu1 %v814_v31 }
 0x523   :  { %849 = vmatpush.msra.mxu3 %v692_v28  ;;  %876 = vmatpush.msrb.mxu2 %v692_v28 }
 0x525   :  { %850 = vmatpush.msra.mxu3 %v691_v30  ;;  %877 = vmatpush.msrb.mxu2 %v691_v30 }
 0x526   :  { %822 = vmatpush.bf16.msra.mxu1 %v813_v33 }
 0x527   :  { %851 = vmatpush.msra.mxu3 %v690_v32  ;;  %878 = vmatpush.msrb.mxu2 %v690_v32 }
 0x529   :  { %852 = vmatpush.msra.mxu3 %v689_v37  ;;  %879 = vmatpush.msrb.mxu2 %v689_v37 }
 0x52a   :  { %823 = vmatpush.bf16.msra.mxu1 %v812_v38 }
 0x52b   :  { %853 = vmatpush.msra.mxu3 %v688_v40  ;;  %880 = vmatpush.msrb.mxu2 %v688_v40 }
 0x52e   :  { %824 = vmatpush.bf16.msra.mxu1 %v811_v41 }
 0x532   :  { %825 = vmatpush.bf16.msra.mxu1 %v810_v44 }
 0x536   :  { %826 = vmatpush.bf16.msra.mxu1 %v809_v48 }
 0x53a   :  { %827 = vmatpush.bf16.msra.mxu1 %v808_v51  ;;  %v687_v51 = vld [vmem:[%s2112_s4 + $0x10] sm:$0xff] }
 0x53b   :  { %854 = vmatpush.msra.mxu3 %v687_v51  ;;  %881 = vmatpush.msrb.mxu2 %v687_v51  ;;  %v988_v51 = vld [vmem:[%s2084_s21 + $0x30] sm:$0xff] }
 0x53d   :  { %828 = vmatmul.bf16.vlgmr.msra.gmra.mxu1 %v1423_v35 }
 0x54d   :  { %833 = vmatmul.bf16.gmra.mxu1 %v1685_v45  ;;  %v716_v45 = vld [vmem:[%s2078_s15 + $0x70] sm:$0xff] }
 0x54e   :  { %v726_v60 = vpack.c.bf16 %v717_v59, %v716_v45 }
 0x550   :  { %731 = vmatpush.bf16.msra.mxu0 %v726_v60 }
 0x554   :  { %732 = vmatpush.bf16.msra.mxu0 %v725_v63 }
 0x558   :  { %733 = vmatpush.bf16.msra.mxu0 %v724_v2 }
 0x55c   :  { %734 = vmatpush.bf16.msra.mxu0 %v723_v5 }
 0x560   :  { %735 = vmatpush.bf16.msra.mxu0 %v722_v7 }
 0x564   :  { %736 = vmatpush.bf16.msra.mxu0 %v721_v11 }
 0x568   :  { %737 = vmatpush.bf16.msra.mxu0 %v720_v14  ;;  %v994_v14 = vld [vmem:[%s2084_s21 + $0x60] sm:$0xff] }
 0x56c   :  { %738 = vmatpush.bf16.msra.mxu0 %v719_v17  ;;  %v1006_v17 = vpack.c.bf16 %v997_v13, %v996_v12 }
 0x56e   :  { %1011 = vmatpush.bf16.msrb.mxu1 %v1006_v17  ;;  %v1064_v17 = vld [vmem:[%s2086_s23 + $0x78] sm:$0xff] }
 0x578   :  { %v515_v52 = vpop.f32.mrf.mxu3 }
 0x579   :  { %646 = vrot.lane.b32.xlu2 %v515_v52, %s1221_s2  ;;  %v686_v52 = vld [vmem:[%s2112_s4 + $0x8] sm:$0xff] }
 0x57a   :  { %v1827_v54 = vpop.f32.mrf.mxu1  ;;  %855 = vmatpush.msra.mxu3 %v686_v52  ;;  %882 = vmatpush.msrb.mxu2 %v686_v52  ;;  %v989_v52 = vld [vmem:[%s2084_s21 + $0x38] sm:$0xff] }
 0x580   :  { %v517_v53 = vpop.f32.mrf.mxu3 }
 0x581   :  { %648 = vrot.lane.b32.xlu2 %v517_v53, %s1221_s2  ;;  %v685_v53 = vld [vmem:[%s2112_s4] sm:$0xff]  ;;  %s1223_s2 = smov [#allocation2]  }
 0x582   :  { %v1829_v55 = vpop.f32.mrf.mxu1  ;;  %856 = vmatpush.msra.mxu3 %v685_v53  ;;  %883 = vmatpush.msrb.mxu2 %v685_v53  ;;  %v1002_v53 = vpack.c.bf16 %v989_v52, %v988_v51  ;;  %s1095_s0 = sshll.u32 %s1223_s2, 4  ;;  %s1096_s0 = int_to_ptr.vmem [resolvable:$true] %s1095_s0 }
 0x593   :  { %v639_v56 = vpop.f32.mrf.mxu3 }
 0x594   :  { %662 = vrot.lane.b32.xlu1 %v639_v56, %s1220_s8 }
 0x59a   :  { %v577_v57 = vpop.f32.mrf.mxu1 }
 0x59b   :  { %654 = vrot.lane.b32.xlu0 %v577_v57, %s1222_s30  ;;  %v641_v58 = vpop.f32.mrf.mxu3  ;;  %v1139_v57 = vld [vmem:[%s2081_s18] ss:$0 sm:$0xff]  ;;  %s1097_s18 = sshll.u32 %s2088_s25, 4  ;;  %s1098_s18 = int_to_ptr.hbm [resolvable:$true] %s1097_s18 }
 0x5a2   :  { %v579_v35 = vpop.f32.mrf.mxu1 }
 0x5a3   :  { %656 = vrot.lane.b32.xlu2 %v579_v35, %s1222_s30  ;;  %664 = vrot.lane.b32.xlu0 %v641_v58, %s1220_s8  ;;  %v1142_v58 = vld [vmem:[%s2079_s16] ss:$0 sm:$0xff]  ;;  %s2113_s16 = sld [smem:[#allocation9_spill]] }
 0x5a9   :  { %v701_v6 = vld [vmem:[%s2113_s16] sm:$0xff] }
 0x5aa   :  { %935 = vmatpush.msrb.mxu3 %v701_v6  ;;  %970 = vmatpush.msrb.mxu0 %v701_v6 }
 0x5d3   :  { %v647_v21 = vpop.permute.xlu2 %646 }
 0x5d4   :  { %v669_v31 = vsel %vm668_vm15, %v1827_v54, %v647_v21  ;;  %v782_v54 = vpop.f32.mrf.mxu2  ;;  %v1005_v21 = vpack.c.bf16 %v995_v18, %v994_v14  ;;  %v1063_v18 = vld [vmem:[%s2086_s23 + $0x70] sm:$0xff] }
 0x5d5   :  { %v783_v45 = vadd.f32 %v1139_v57, %v782_v54  ;;  %v986_v54 = vld [vmem:[%s2084_s21 + $0x20] sm:$0xff] }
 0x5d6   :  { %1012 = vmatpush.bf16.msrb.mxu1 %v1005_v21  ;;  %v1060_v21 = vld [vmem:[%s2086_s23 + $0x58] sm:$0xff] }
 0x5db   :  { %v649_v27 = vpop.permute.xlu2 %648 }
 0x5dc   :  { %v670_v41 = vsel %vm668_vm15, %v1829_v55, %v649_v27  ;;  %v784_v55 = vpop.f32.mrf.mxu2 }
 0x5dd   :  { %v785_v1 = vadd.f32 %v1139_v57, %v784_v55  ;;  %v987_v55 = vld [vmem:[%s2084_s21 + $0x28] sm:$0xff] }
 0x5e4   :  { %v787_v56 = vpop.f32.mrf.mxu2 }
 0x5e5   :  { %v788_v59 = vadd.f32 %v1139_v57, %v787_v56  ;;  %v1001_v56 = vpack.c.bf16 %v987_v55, %v986_v54 }
 0x5ec   :  { %v789_v63 = vpop.f32.mrf.mxu2 }
 0x5ed   :  { %v790_v2 = vadd.f32 %v1139_v57, %v789_v63  ;;  %v984_v57 = vld [vmem:[%s2084_s21 + $0x10] sm:$0xff] }
 0x5fd   :  { %v657_v38 = vpop.permute.xlu2 %656 }
 0x5fe   :  { %v673_v42 = vsel %vm671_vm1, %v670_v41, %v657_v38 }
 0x606   :  { %v663_v33 = vpop.permute.xlu1 %662 }
 0x60d   :  { %v655_v29 = vpop.permute.xlu0 %654 }
 0x60e   :  { %v672_v34 = vsel %vm671_vm1, %v669_v31, %v655_v29  ;;  %v1004_v29 = vpack.c.bf16 %v993_v25, %v992_v24  ;;  %v1057_v24 = vld [vmem:[%s2086_s23 + $0x40] sm:$0xff]  ;;  %v1056_v25 = vld [vmem:[%s2086_s23 + $0x38] sm:$0xff] }
 0x60f   :  { %v675_v39 = vsel %vm674_vm2, %v672_v34, %v663_v33 }
 0x610   :  { %v681_v43 = vadd.f32 %v1141_v36, %v675_v39  ;;  %1013 = vmatpush.bf16.msrb.mxu1 %v1004_v29  ;;  %v1053_v29 = vld [vmem:[%s2086_s23 + $0x20] sm:$0xff] }
 0x612   :  { %v683_v48 = vmax.f32 %v681_v43, 0.0 }
 0x615   :  { %v665_v44 = vpop.permute.xlu0 %664 }
 0x616   :  { %v676_v46 = vsel %vm674_vm2, %v673_v42, %v665_v44 }
 0x617   :  { %v682_v47 = vadd.f32 %v1141_v36, %v676_v46 }
 0x619   :  { %v684_v49 = vmax.f32 %v682_v47, 0.0 }
 0x61b   :  { %v718_v50 = vpack.c.bf16 %v684_v49, %v683_v48  ;;  %v990_v48 = vld [vmem:[%s2084_s21 + $0x40] sm:$0xff]  ;;  %v991_v49 = vld [vmem:[%s2084_s21 + $0x48] sm:$0xff] }
 0x61d   :  { %739 = vmatmul.bf16.vlgmr.msra.gmra.mxu0 %v718_v50  ;;  %v1003_v50 = vpack.c.bf16 %v991_v49, %v990_v48 }
 0x61e   :  { %1069 = vmatpush.msra.mxu0 %v1064_v17 }
 0x61f   :  { %1014 = vmatpush.bf16.msrb.mxu1 %v1003_v50 }
 0x620   :  { %1070 = vmatpush.msra.mxu0 %v1063_v18 }
 0x623   :  { %1015 = vmatpush.bf16.msrb.mxu1 %v1002_v53 }
 0x627   :  { %1016 = vmatpush.bf16.msrb.mxu1 %v1001_v56 }
 0x69a   :  { %v740_v35 = vpop.f32.mrf.mxu0 }
 0x69b   :  { %v741_v60 = vadd.f32 %v1142_v58, %v740_v35  ;;  %v829_v35 = vpop.f32.mrf.mxu1 }
 0x69d   :  { %v839_v61 = vmul.f32 %v783_v45, %v741_v60  ;;  %v866_v62 = vmul.f32 %v788_v59, %v741_v60  ;;  %v982_v59 = vld [vmem:[%s2084_s21] sm:$0xff]  ;;  %v983_v60 = vld [vmem:[%s2084_s21 + $0x8] sm:$0xff] }
 0x69f   :  { %857 = vmatmul.f32.vlgmr.msra.gmra.mxu3 %v839_v61  ;;  %884 = vmatmul.f32.vlgmr.msrb.gmra.mxu2 %v866_v62  ;;  %v999_v61 = vpack.c.bf16 %v983_v60, %v982_v59 }
 0x6a2   :  { %v742_v0 = vpop.f32.mrf.mxu0 }
 0x6a3   :  { %v743_v3 = vadd.f32 %v1142_v58, %v742_v0  ;;  %v985_v58 = vld [vmem:[%s2084_s21 + $0x18] sm:$0xff]  ;;  %v831_v62 = vpop.f32.mrf.mxu1 }
 0x6a4   :  { %v1000_v45 = vpack.c.bf16 %v985_v58, %v984_v57 }
 0x6a5   :  { %v840_v4 = vmul.f32 %v785_v1, %v743_v3  ;;  %v867_v5 = vmul.f32 %v790_v2, %v743_v3  ;;  %v1140_v2 = vld [vmem:[%s2083_s20] ss:$0 sm:$0xff] }
 0x6a6   :  { %1017 = vmatpush.bf16.msrb.mxu1 %v1000_v45  ;;  %v832_v6 = vadd.f32 %v1140_v2, %v831_v62 }
 0x6a7   :  { %860 = vmatmul.f32.gmra.mxu3 %v840_v4  ;;  %887 = vmatmul.f32.gmra.mxu2 %v867_v5  ;;  %v830_v4 = vadd.f32 %v1140_v2, %v829_v35 }
 0x6aa   :  { %1018 = vmatpush.bf16.msrb.mxu1 %v999_v61 }
 0x6ab   :  { %v834_v63 = vpop.f32.mrf.mxu1 }
 0x6b3   :  { %v836_v3 = vpop.f32.mrf.mxu1 }
 0x722   :  { %v858_v10 = vpop.f32.mrf.mxu3  ;;  %v885_v7 = vpop.f32.mrf.mxu2 }
 0x723   :  { %v864_v8 = vmul.f32 0.25, %v858_v10  ;;  %v891_v9 = vmul.f32 0.25, %v885_v7  ;;  %v835_v10 = vadd.f32 %v1140_v2, %v834_v63  ;;  %v837_v7 = vadd.f32 %v1140_v2, %v836_v3 }
 0x725   :  { %v893_v11 = vmax.f32 %v864_v8, %v891_v9 }
 0x727   :  { %v895_v15 = vsub.f32 %v864_v8, %v893_v11  ;;  %v901_v16 = vsub.f32 %v891_v9, %v893_v11 }
 0x729   :  { %v897_v19 = vmul.f32 1.442695, %v895_v15  ;;  %v903_v20 = vmul.f32 1.442695, %v901_v16 }
 0x72a   :  { %v861_v22 = vpop.f32.mrf.mxu3  ;;  %v888_v23 = vpop.f32.mrf.mxu2 }
 0x72b   :  { %1177 = vpow2.f32 %v897_v19  ;;  %v865_v26 = vmul.f32 0.25, %v861_v22  ;;  %v892_v27 = vmul.f32 0.25, %v888_v23  ;;  %v1062_v19 = vld [vmem:[%s2086_s23 + $0x68] sm:$0xff]  ;;  %v1059_v22 = vld [vmem:[%s2086_s23 + $0x50] sm:$0xff] }
 0x72c   :  { %1179 = vpow2.f32 %v903_v20  ;;  %v1061_v20 = vld [vmem:[%s2086_s23 + $0x60] sm:$0xff]  ;;  %1071 = vmatpush.msra.mxu0 %v1062_v19  ;;  %v1058_v23 = vld [vmem:[%s2086_s23 + $0x48] sm:$0xff] }
 0x72d   :  { %v894_v28 = vmax.f32 %v865_v26, %v892_v27 }
 0x72e   :  { %1072 = vmatpush.msra.mxu0 %v1061_v20 }
 0x72f   :  { %v896_v30 = vsub.f32 %v865_v26, %v894_v28  ;;  %v902_v31 = vsub.f32 %v892_v27, %v894_v28  ;;  %v1055_v26 = vld [vmem:[%s2086_s23 + $0x30] sm:$0xff]  ;;  %v1054_v28 = vld [vmem:[%s2086_s23 + $0x28] sm:$0xff] }
 0x730   :  { %1073 = vmatpush.msra.mxu0 %v1060_v21 }
 0x731   :  { %v1178_v34 = vpop.eup %1177  ;;  %v899_v32 = vmul.f32 1.442695, %v896_v30  ;;  %v905_v33 = vmul.f32 1.442695, %v902_v31  ;;  %v1052_v30 = vld [vmem:[%s2086_s23 + $0x18] sm:$0xff]  ;;  %v1051_v31 = vld [vmem:[%s2086_s23 + $0x10] sm:$0xff] }
 0x732   :  { %v1180_v36 = vpop.eup %1179  ;;  %1074 = vmatpush.msra.mxu0 %v1059_v22 }
 0x733   :  { %v907_v37 = vadd.f32 %v1180_v36, %v1178_v34  ;;  %1181 = vpow2.f32 %v899_v32 }
 0x734   :  { %1183 = vpow2.f32 %v905_v33  ;;  %1075 = vmatpush.msra.mxu0 %v1058_v23  ;;  %v1050_v33 = vld [vmem:[%s2086_s23 + $0x8] sm:$0xff] }
 0x735   :  { %1185 = vrcp.f32 %v907_v37 }
 0x736   :  { %1076 = vmatpush.msra.mxu0 %v1057_v24 }
 0x738   :  { %1077 = vmatpush.msra.mxu0 %v1056_v25 }
 0x739   :  { %v1182_v38 = vpop.eup %1181 }
 0x73a   :  { %v1184_v39 = vpop.eup %1183  ;;  %1078 = vmatpush.msra.mxu0 %v1055_v26 }
 0x73b   :  { %v1186_v40 = vpop.eup %1185  ;;  %v908_v41 = vadd.f32 %v1184_v39, %v1182_v38 }
 0x73c   :  { %v947_v42 = vmul.f32 %v1186_v40, %v1180_v36  ;;  %v911_v43 = vmul.f32 %v1186_v40, %v1178_v34  ;;  %1079 = vmatpush.msra.mxu0 %v1054_v28  ;;  %v1143_v34 = vld [vmem:[%s2085_s22] ss:$0 sm:$0xff] }
 0x73d   :  { %1187 = vrcp.f32 %v908_v41  ;;  %v1144_v41 = vld [vmem:[%s2087_s24] ss:$0 sm:$0xff] }
 0x73e   :  { %1115 = vmatmul.msk.f32.vlgmr.msrb.gmra.mxu3 %vm913_vm3, %v911_v43  ;;  %1117 = vmatmul.msk.f32.vlgmr.msrb.gmra.mxu0 %vm913_vm3, %v947_v42 }
 0x73f   :  { %1080 = vmatpush.msra.mxu0 %v1053_v29 }
 0x741   :  { %1081 = vmatpush.msra.mxu0 %v1052_v30 }
 0x743   :  { %v1188_v44 = vpop.eup %1187  ;;  %1082 = vmatpush.msra.mxu0 %v1051_v31 }
 0x744   :  { %v912_v46 = vmul.f32 %v1188_v44, %v1182_v38  ;;  %v948_v47 = vmul.f32 %v1188_v44, %v1184_v39  ;;  %v1025_v38 = vld [vmem:[%s2114_s17] sm:$0x3] }
 0x745   :  { %1083 = vmatpush.msra.mxu0 %v1050_v33  ;;  %v1049_v39 = vld [vmem:[%s2086_s23] sm:$0xff] }
 0x746   :  { %1116 = vmatmul.msk.f32.gmra.mxu3 %vm913_vm3, %v912_v46  ;;  %1118 = vmatmul.msk.f32.gmra.mxu0 %vm913_vm3, %v948_v47 }
 0x747   :  { %1084 = vmatpush.msra.mxu0 %v1049_v39 }
 0x7bb   :  { %v972_v0 = vpop.f32.mrf.mxu0 }
 0x7bc   :  { %v978_v11 = vmul.f32 %v972_v0, %v835_v10 }
 0x7c1   :  { %v937_v1 = vpop.f32.mrf.mxu3 }
 0x7c2   :  { %v943_v8 = vmul.f32 %v937_v1, %v830_v4 }
 0x7c3   :  { %v975_v5 = vpop.f32.mrf.mxu0 }
 0x7c4   :  { %v979_v12 = vmul.f32 %v975_v5, %v837_v7  ;;  %v980_v14 = vadd.f32 %v978_v11, %v943_v8 }
 0x7c9   :  { %v940_v9 = vpop.f32.mrf.mxu3 }
 0x7ca   :  { %v944_v13 = vmul.f32 %v940_v9, %v832_v6 }
 0x7cc   :  { %v981_v15 = vadd.f32 %v979_v12, %v944_v13 }
 0x7ce   :  { %v998_v16 = vpack.c.bf16 %v981_v15, %v980_v14 }
 0x7d0   :  { %1019 = vmatmul.bf16.vlgmr.msrb.gmra.mxu1 %v998_v16 }
 0x84d   :  { %v1020_v27 = vpop.f32.mrf.mxu1 }
 0x84e   :  { %v1021_v37 = vadd.f32 %v1143_v34, %v1020_v27 }
 0x855   :  { %v1022_v32 = vpop.f32.mrf.mxu1 }
 0x856   :  { %v1023_v36 = vadd.f32 %v1143_v34, %v1022_v32 }
 0x858   :  { %1043 = vmatpush.msra.mxu3 %v1023_v36 }
 0x85a   :  { %1044 = vmatpush.msra.mxu3 %v1021_v37 }
 0x85b   :  { %1119 = vmatmul.msk.f32.vlgmr.msra.gmra.mxu3 %vm135_vm0, %v1025_v38 }
 0x8de   :  { %v1046_v40 = vpop.f32.mrf.mxu3 }
 0x8df   :  { %1085 = vmatmul.f32.vlgmr.msra.gmra.mxu0 %v1046_v40 }
 0x95c   :  { %v1086_v42 = vpop.f32.mrf.mxu0 }
 0x95d   :  { %v1087_v43 = vadd.f32 %v1144_v41, %v1086_v42 }
 0x95f   :  { %1089 = vst [vmem:[#allocation2] sm:$0x3] %v1087_v43 }
 0x960   :  { %1100 = dma.vmem_to_hbm [thread:$0]  %s1096_s0, 32, %s1098_s18, [#allocation3]  }
 0x961   :  { %1213 = dma.done.wait [#allocation3], 32  }
 0x962   :  { %1214 = vsyncadd [#allocation3], 4294967264 }
 0x963   :  { %1105 = vsyncpa [#allocation3], 1 }

</bundles_post_ra>
